<compile_context>
chip_gen: v5e
topology: v5e:2x2
jax: 0.10.0
libtpu: 0.0.40
codegen_flags: <defaults>
</compile_context>

<pallas_src>
import functools

import jax
import jax.numpy as jnp
from jax import lax
from jax.experimental import pallas as pl
from jax.experimental.pallas import tpu as pltpu

EPS = 1e-5
NEG_SLOPE = 0.2


def _leaky_relu(x):
    # valid for 0 < slope < 1: max(x, slope*x) == leaky_relu(x)
    return jnp.maximum(x, NEG_SLOPE * x)


def _hidden(x_ref, w1t_ref, b1_ref):
    """h1 = lrelu(W1^T @ x + b1), channel-major; returns bf16 (ndf, TP) for the next MXU dot."""
    xb = x_ref[...].astype(jnp.bfloat16)                                 # (Cin, TP)
    h1 = jnp.dot(w1t_ref[...], xb, preferred_element_type=jnp.float32)   # bf16 x bf16 -> f32 acc
    h1 = h1 + b1_ref[...]
    return _leaky_relu(h1).astype(jnp.bfloat16)                          # (ndf, TP)


# ---------------------------------------------------------------------------
# Stage 1: per-tile partial per-channel sum / sum-of-squares of h2 (no h2 writeback).
# ---------------------------------------------------------------------------
def _stage1_kernel(x_ref, w1t_ref, b1_ref, w2t_ref, sum_ref, sq_ref, *, hw, tile_hw):
    i = pl.program_id(1)
    h1 = _hidden(x_ref, w1t_ref, b1_ref)                                 # (ndf, TP) bf16
    h2 = jnp.dot(w2t_ref[...], h1, preferred_element_type=jnp.float32)   # (2*ndf, TP) f32

    if hw % tile_hw != 0:
        # Zero out padded pixel columns (NaN-safe via where) so they don't pollute the stats.
        col = lax.broadcasted_iota(jnp.int32, (1, tile_hw), 1)
        valid = (i * tile_hw + col) < hw
        h2 = jnp.where(valid, h2, 0.0)

    sum_ref[...] = jnp.sum(h2, axis=1, keepdims=True)                    # (2*ndf, 1)
    sq_ref[...] = jnp.sum(h2 * h2, axis=1, keepdims=True)                # (2*ndf, 1)


# ---------------------------------------------------------------------------
# Stage 2: recompute h2 with BN scale folded into W2, add shift, lrelu, final 1x1 conv.
# ---------------------------------------------------------------------------
def _stage2_kernel(x_ref, w1t_ref, b1_ref, w2ts_ref, shift_ref, w3t_ref, o_ref):
    h1 = _hidden(x_ref, w1t_ref, b1_ref)                                 # (ndf, TP) bf16
    h2s = jnp.dot(w2ts_ref[...], h1, preferred_element_type=jnp.float32)  # scale folded into W2
    h = _leaky_relu(h2s + shift_ref[...]).astype(jnp.bfloat16)           # (2*ndf, TP)
    o_ref[...] = jnp.dot(w3t_ref[...], h, preferred_element_type=jnp.float32)  # (1, TP) f32


def _round_up(a, b):
    return ((a + b - 1) // b) * b


def pixel_discriminator_forward(x_nchw, params, *, tile_hw=4096):
    """Forward pass of PixelDiscriminator. x_nchw: (N, Cin, H, W) float32."""
    w1, b1, w2, gamma, beta, w3 = (
        params["w1"], params["b1"], params["w2"],
        params["gamma"], params["beta"], params["w3"],
    )
    n, cin, hh, ww = x_nchw.shape
    ndf = w1.shape[1]
    ndf2 = w2.shape[1]
    hw = hh * ww
    p = n * hw

    # tile_hw is a tunable (sweep 2048-8192; cap at 4096 on v5e unless raising vmem limit).
    tile_hw = min(tile_hw, _round_up(hw, 128))
    # v7x megacore: ensure >= 2 total grid steps so both TensorCores get work.
    if n * pl.cdiv(hw, tile_hw) < 2 and hw > 128:
        tile_hw = _round_up(pl.cdiv(hw, 2), 128)
    grid_hw = pl.cdiv(hw, tile_hw)
    hw_pad = grid_hw * tile_hw

    # Free reshape only; x stays f32 in HBM and is cast to bf16 inside the kernels.
    x3 = x_nchw.reshape(n, cin, hw)

    f32, bf16 = jnp.float32, jnp.bfloat16
    # Transposed (channel-major) weights in bf16 for the native MXU path; bias stays f32.
    w1t = jnp.transpose(w1).astype(bf16)           # (ndf, cin)
    w2t = jnp.transpose(w2).astype(bf16)           # (ndf2, ndf)   -- stage 1 (unscaled)
    w3t = jnp.transpose(w3).astype(bf16)           # (1, ndf2)
    b1c = b1.reshape(ndf, 1).astype(f32)           # broadcast over lane (pixel) axis

    # ---- stage 1: per-tile partial BatchNorm statistics -----------------------------------
    stage1 = functools.partial(_stage1_kernel, hw=hw, tile_hw=tile_hw)
    sum_part, sq_part = pl.pallas_call(
        stage1,
        out_shape=(
            jax.ShapeDtypeStruct((n, grid_hw, ndf2, 1), f32),
            jax.ShapeDtypeStruct((n, grid_hw, ndf2, 1), f32),
        ),
        grid_spec=pltpu.PrefetchScalarGridSpec(
            num_scalar_prefetch=0,
            grid=(n, grid_hw),
            in_specs=[
                pl.BlockSpec((None, cin, tile_hw), lambda b, i: (b, 0, i)),
                pl.BlockSpec((ndf, cin), lambda b, i: (0, 0)),
                pl.BlockSpec((ndf, 1), lambda b, i: (0, 0)),
                pl.BlockSpec((ndf2, ndf), lambda b, i: (0, 0)),
            ],
            out_specs=[
                pl.BlockSpec((None, None, ndf2, 1), lambda b, i: (b, i, 0, 0)),
                pl.BlockSpec((None, None, ndf2, 1), lambda b, i: (b, i, 0, 0)),
            ],
        ),
        compiler_params=pltpu.CompilerParams(
            dimension_semantics=("parallel", "parallel")),
    )(x3, w1t, b1c, w2t)

    # ---- tiny XLA glue: reduce partials, fold BN (training-mode, biased variance) ---------
    csum = jnp.sum(sum_part, axis=(0, 1))          # (ndf2, 1)
    csq = jnp.sum(sq_part, axis=(0, 1))            # (ndf2, 1)
    mean = csum / p
    var = jnp.maximum(csq / p - mean * mean, 0.0)  # clamp: E[x^2]-E[x]^2 can go tiny-negative
    scale = gamma.reshape(ndf2, 1).astype(f32) * lax.rsqrt(var + EPS)
    shift = beta.reshape(ndf2, 1).astype(f32) - mean * scale
    # Fold the BN per-channel scale into W2 so stage 2 pays only the +shift add on the VPU.
    w2ts = (jnp.transpose(w2).astype(f32) * scale).astype(bf16)   # (ndf2, ndf)

    # ---- stage 2: recompute h2 (scaled), shift, lrelu, final 1x1 conv -> lane-dense (1, TP)
    out3 = pl.pallas_call(
        _stage2_kernel,
        out_shape=jax.ShapeDtypeStruct((n, 1, hw_pad), f32),
        grid_spec=pltpu.PrefetchScalarGridSpec(
            num_scalar_prefetch=0,
            grid=(n, grid_hw),
            in_specs=[
                pl.BlockSpec((None, cin, tile_hw), lambda b, i: (b, 0, i)),
                pl.BlockSpec((ndf, cin), lambda b, i: (0, 0)),
                pl.BlockSpec((ndf, 1), lambda b, i: (0, 0)),
                pl.BlockSpec((ndf2, ndf), lambda b, i: (0, 0)),
                pl.BlockSpec((ndf2, 1), lambda b, i: (0, 0)),
                pl.BlockSpec((1, ndf2), lambda b, i: (0, 0)),
            ],
            out_specs=pl.BlockSpec((None, 1, tile_hw), lambda b, i: (b, 0, i)),
        ),
        compiler_params=pltpu.CompilerParams(
            dimension_semantics=("parallel", "parallel")),
    )(x3, w1t, b1c, w2ts, shift, w3t)

    out = out3[:, :, :hw] if hw_pad != hw else out3
    return out.reshape(n, 1, hh, ww)


def init_params(key, cin, ndf):
    """Deterministic synthetic parameters matching PixelDiscriminator shapes.

    PyTorch conv weight (Cout, Cin, 1, 1) is stored here as a (Cin, Cout) matrix.
    """
    ks = jax.random.split(key, 6)
    ndf2 = 2 * ndf
    return {
        "w1": (0.02 * jax.random.normal(ks[0], (cin, ndf))).astype(jnp.float32),
        "b1": (0.02 * jax.random.normal(ks[1], (ndf,))).astype(jnp.float32),
        "w2": (0.02 * jax.random.normal(ks[2], (ndf, ndf2))).astype(jnp.float32),
        "gamma": (1.0 + 0.02 * jax.random.normal(ks[3], (ndf2,))).astype(jnp.float32),
        "beta": (0.02 * jax.random.normal(ks[4], (ndf2,))).astype(jnp.float32),
        "w3": (0.02 * jax.random.normal(ks[5], (ndf2, 1))).astype(jnp.float32),
    }


def _reference_forward(x_nchw, params):
    """Pure-JAX reference mirroring the PyTorch module (training-mode BatchNorm).

    Mirrors the kernel's explicit quantization choices (bf16 matmul operands, f32
    accumulation) so the comparison isolates kernel structure; the only remaining delta is
    the bf16 rounding of the BN-scale-folded W2 (~1e-3 relative), covered by the tolerance.
    """
    n, cin, hh, ww = x_nchw.shape
    f32, bf16 = jnp.float32, jnp.bfloat16
    x = jnp.transpose(x_nchw.astype(bf16), (0, 2, 3, 1)).reshape(-1, cin)    # (P, Cin) bf16
    w1b = params["w1"].astype(bf16)
    w2b = params["w2"].astype(bf16)
    w3b = params["w3"].astype(bf16)
    h1 = _leaky_relu(jnp.dot(x, w1b, preferred_element_type=f32) + params["b1"][None, :])
    h2 = jnp.dot(h1.astype(bf16), w2b, preferred_element_type=f32)
    mean = jnp.mean(h2, axis=0, keepdims=True)
    var = jnp.maximum(jnp.mean(h2 * h2, axis=0, keepdims=True) - mean * mean, 0.0)
    h2n = (h2 - mean) * lax.rsqrt(var + EPS) * params["gamma"][None, :] + params["beta"][None, :]
    out = jnp.dot(_leaky_relu(h2n).astype(bf16), w3b, preferred_element_type=f32)
    return jnp.transpose(out.reshape(n, hh, ww, 1), (0, 3, 1, 2))


if __name__ == "__main__":
    N, CIN, H, W = 2, 4, 16, 16
    NDF = 64

    key = jax.random.PRNGKey(0)
    kx, kp = jax.random.split(key)
    x = jax.random.normal(kx, (N, CIN, H, W), dtype=jnp.float32)
    params = init_params(kp, CIN, NDF)

    out = jax.jit(pixel_discriminator_forward)(x, params)
    out = jax.block_until_ready(out)

    ref = _reference_forward(x, params)
    assert out.shape == (N, 1, H, W), out.shape
    # Tolerance covers bf16 operand rounding (incl. BN-scale folded into W2); acc stays f32.
    assert jnp.allclose(out, ref, rtol=5e-3, atol=5e-3), float(jnp.max(jnp.abs(out - ref)))

    print("KERNEL_OK")
</pallas_src>

<mosaic_0001>
module attributes {stable_mosaic.version = 11 : i64} {
  func.func @_stage1_kernel(%arg0: i32, %arg1: i32, %arg2: memref<1x4x256xf32, #tpu.memory_space<vmem>>, %arg3: memref<64x4xbf16, #tpu.memory_space<vmem>>, %arg4: memref<64x1xf32, #tpu.memory_space<vmem>>, %arg5: memref<128x64xbf16, #tpu.memory_space<vmem>>, %arg6: memref<1x1x128x1xf32, #tpu.memory_space<vmem>>, %arg7: memref<1x1x128x1xf32, #tpu.memory_space<vmem>>) attributes {dimension_semantics = [#tpu.dimension_semantics<parallel>, #tpu.dimension_semantics<parallel>], iteration_bounds = array<i64: 2, 1>, scalar_prefetch = 0 : i64, scratch_operands = 0 : i64, tpu.core_type = #tpu.core_type<tc>, window_params = [{transform_indices = @transform_0, window_bounds = array<i64: 1, 4, 256>}, {pipeline_mode = #tpu.pipeline_mode<synchronous>, transform_indices = @transform_1, window_bounds = array<i64: 64, 4>}, {pipeline_mode = #tpu.pipeline_mode<synchronous>, transform_indices = @transform_2, window_bounds = array<i64: 64, 1>}, {pipeline_mode = #tpu.pipeline_mode<synchronous>, transform_indices = @transform_3, window_bounds = array<i64: 128, 64>}, {transform_indices = @transform_4, window_bounds = array<i64: 1, 1, 128, 1>}, {transform_indices = @transform_5, window_bounds = array<i64: 1, 1, 128, 1>}]} {
    %c0 = arith.constant 0 : index
    %c0_0 = arith.constant 0 : index
    %c0_1 = arith.constant 0 : index
    %0 = vector.load %arg2[%c0, %c0_0, %c0_1] : memref<1x4x256xf32, #tpu.memory_space<vmem>>, vector<1x4x256xf32>
    %1 = vector.shape_cast %0 : vector<1x4x256xf32> to vector<4x256xf32>
    %2 = arith.truncf %1 : vector<4x256xf32> to vector<4x256xbf16>
    %c0_2 = arith.constant 0 : index
    %c0_3 = arith.constant 0 : index
    %3 = vector.load %arg3[%c0_2, %c0_3] : memref<64x4xbf16, #tpu.memory_space<vmem>>, vector<64x4xbf16>
    %cst = arith.constant dense<0.000000e+00> : vector<64x256xf32>
    %4 = tpu.matmul %3, %2, %cst {dimension_numbers = #tpu.dot_dimension_numbers<[1], [0], [0], [1], [0, 0, 1, 1], [], []>} : vector<64x4xbf16>, vector<4x256xbf16>, vector<64x256xf32> -> vector<64x256xf32>
    %c0_4 = arith.constant 0 : index
    %c0_5 = arith.constant 0 : index
    %5 = vector.load %arg4[%c0_4, %c0_5] : memref<64x1xf32, #tpu.memory_space<vmem>>, vector<64x1xf32>
    %6 = vector.broadcast %5 : vector<64x1xf32> to vector<64x256xf32>
    %7 = arith.addf %4, %6 : vector<64x256xf32>
    %cst_6 = arith.constant 2.000000e-01 : f32
    %8 = vector.broadcast %cst_6 : f32 to vector<64x256xf32>
    %9 = arith.mulf %8, %7 : vector<64x256xf32>
    %10 = arith.maximumf %7, %9 : vector<64x256xf32>
    %11 = arith.truncf %10 : vector<64x256xf32> to vector<64x256xbf16>
    %c0_7 = arith.constant 0 : index
    %c0_8 = arith.constant 0 : index
    %12 = vector.load %arg5[%c0_7, %c0_8] : memref<128x64xbf16, #tpu.memory_space<vmem>>, vector<128x64xbf16>
    %cst_9 = arith.constant dense<0.000000e+00> : vector<128x256xf32>
    %13 = tpu.matmul %12, %11, %cst_9 {dimension_numbers = #tpu.dot_dimension_numbers<[1], [0], [0], [1], [0, 0, 1, 1], [], []>} : vector<128x64xbf16>, vector<64x256xbf16>, vector<128x256xf32> -> vector<128x256xf32>
    %cst_10 = arith.constant dense<0.000000e+00> : vector<128xf32>
    %14 = vector.multi_reduction <add>, %13, %cst_10 [1] : vector<128x256xf32> to vector<128xf32>
    %15 = vector.shape_cast %14 : vector<128xf32> to vector<128x1xf32>
    %c0_11 = arith.constant 0 : index
    %c0_12 = arith.constant 0 : index
    %c0_13 = arith.constant 0 : index
    %c0_14 = arith.constant 0 : index
    %16 = vector.load %arg6[%c0_11, %c0_12, %c0_13, %c0_14] : memref<1x1x128x1xf32, #tpu.memory_space<vmem>>, vector<1x1x128x1xf32>
    %17 = vector.shape_cast %16 : vector<1x1x128x1xf32> to vector<128x1xf32>
    %18 = vector.shape_cast %15 : vector<128x1xf32> to vector<1x1x128x1xf32>
    tpu.vector_store %arg6[%c0_11, %c0_12, %c0_13, %c0_14], %18 {strides = array<i32>} : memref<1x1x128x1xf32, #tpu.memory_space<vmem>>, vector<1x1x128x1xf32>,
    %19 = arith.mulf %13, %13 : vector<128x256xf32>
    %cst_15 = arith.constant dense<0.000000e+00> : vector<128xf32>
    %20 = vector.multi_reduction <add>, %19, %cst_15 [1] : vector<128x256xf32> to vector<128xf32>
    %21 = vector.shape_cast %20 : vector<128xf32> to vector<128x1xf32>
    %c0_16 = arith.constant 0 : index
    %c0_17 = arith.constant 0 : index
    %c0_18 = arith.constant 0 : index
    %c0_19 = arith.constant 0 : index
    %22 = vector.load %arg7[%c0_16, %c0_17, %c0_18, %c0_19] : memref<1x1x128x1xf32, #tpu.memory_space<vmem>>, vector<1x1x128x1xf32>
    %23 = vector.shape_cast %22 : vector<1x1x128x1xf32> to vector<128x1xf32>
    %24 = vector.shape_cast %21 : vector<128x1xf32> to vector<1x1x128x1xf32>
    tpu.vector_store %arg7[%c0_16, %c0_17, %c0_18, %c0_19], %24 {strides = array<i32>} : memref<1x1x128x1xf32, #tpu.memory_space<vmem>>, vector<1x1x128x1xf32>,
    return
  }
  func.func @transform_0(%arg0: i32, %arg1: i32) -> (i32, i32, i32) {
    %c0_i32 = arith.constant 0 : i32
    %c0_i32_0 = arith.constant 0 : i32
    return %arg0, %c0_i32, %arg1 : i32, i32, i32
  }
  func.func @transform_1(%arg0: i32, %arg1: i32) -> (i32, i32) {
    %c0_i32 = arith.constant 0 : i32
    %c0_i32_0 = arith.constant 0 : i32
    %c0_i32_1 = arith.constant 0 : i32
    return %c0_i32, %c0_i32_0 : i32, i32
  }
  func.func @transform_2(%arg0: i32, %arg1: i32) -> (i32, i32) {
    %c0_i32 = arith.constant 0 : i32
    %c0_i32_0 = arith.constant 0 : i32
    %c0_i32_1 = arith.constant 0 : i32
    return %c0_i32, %c0_i32_0 : i32, i32
  }
  func.func @transform_3(%arg0: i32, %arg1: i32) -> (i32, i32) {
    %c0_i32 = arith.constant 0 : i32
    %c0_i32_0 = arith.constant 0 : i32
    %c0_i32_1 = arith.constant 0 : i32
    return %c0_i32, %c0_i32_0 : i32, i32
  }
  func.func @transform_4(%arg0: i32, %arg1: i32) -> (i32, i32, i32, i32) {
    %c0_i32 = arith.constant 0 : i32
    %c0_i32_0 = arith.constant 0 : i32
    %c0_i32_1 = arith.constant 0 : i32
    return %arg0, %arg1, %c0_i32, %c0_i32_0 : i32, i32, i32, i32
  }
  func.func @transform_5(%arg0: i32, %arg1: i32) -> (i32, i32, i32, i32) {
    %c0_i32 = arith.constant 0 : i32
    %c0_i32_0 = arith.constant 0 : i32
    %c0_i32_1 = arith.constant 0 : i32
    return %arg0, %arg1, %c0_i32, %c0_i32_0 : i32, i32, i32, i32
  }
}

module attributes {stable_mosaic.version = 11 : i64} {
  func.func @_stage2_kernel(%arg0: i32, %arg1: i32, %arg2: memref<1x4x256xf32, #tpu.memory_space<vmem>>, %arg3: memref<64x4xbf16, #tpu.memory_space<vmem>>, %arg4: memref<64x1xf32, #tpu.memory_space<vmem>>, %arg5: memref<128x64xbf16, #tpu.memory_space<vmem>>, %arg6: memref<128x1xf32, #tpu.memory_space<vmem>>, %arg7: memref<1x128xbf16, #tpu.memory_space<vmem>>, %arg8: memref<1x1x256xf32, #tpu.memory_space<vmem>>) attributes {dimension_semantics = [#tpu.dimension_semantics<parallel>, #tpu.dimension_semantics<parallel>], iteration_bounds = array<i64: 2, 1>, scalar_prefetch = 0 : i64, scratch_operands = 0 : i64, tpu.core_type = #tpu.core_type<tc>, window_params = [{transform_indices = @transform_0, window_bounds = array<i64: 1, 4, 256>}, {pipeline_mode = #tpu.pipeline_mode<synchronous>, transform_indices = @transform_1, window_bounds = array<i64: 64, 4>}, {pipeline_mode = #tpu.pipeline_mode<synchronous>, transform_indices = @transform_2, window_bounds = array<i64: 64, 1>}, {pipeline_mode = #tpu.pipeline_mode<synchronous>, transform_indices = @transform_3, window_bounds = array<i64: 128, 64>}, {pipeline_mode = #tpu.pipeline_mode<synchronous>, transform_indices = @transform_4, window_bounds = array<i64: 128, 1>}, {pipeline_mode = #tpu.pipeline_mode<synchronous>, transform_indices = @transform_5, window_bounds = array<i64: 1, 128>}, {transform_indices = @transform_6, window_bounds = array<i64: 1, 1, 256>}]} {
    %c0 = arith.constant 0 : index
    %c0_0 = arith.constant 0 : index
    %c0_1 = arith.constant 0 : index
    %0 = vector.load %arg2[%c0, %c0_0, %c0_1] : memref<1x4x256xf32, #tpu.memory_space<vmem>>, vector<1x4x256xf32>
    %1 = vector.shape_cast %0 : vector<1x4x256xf32> to vector<4x256xf32>
    %2 = arith.truncf %1 : vector<4x256xf32> to vector<4x256xbf16>
    %c0_2 = arith.constant 0 : index
    %c0_3 = arith.constant 0 : index
    %3 = vector.load %arg3[%c0_2, %c0_3] : memref<64x4xbf16, #tpu.memory_space<vmem>>, vector<64x4xbf16>
    %cst = arith.constant dense<0.000000e+00> : vector<64x256xf32>
    %4 = tpu.matmul %3, %2, %cst {dimension_numbers = #tpu.dot_dimension_numbers<[1], [0], [0], [1], [0, 0, 1, 1], [], []>} : vector<64x4xbf16>, vector<4x256xbf16>, vector<64x256xf32> -> vector<64x256xf32>
    %c0_4 = arith.constant 0 : index
    %c0_5 = arith.constant 0 : index
    %5 = vector.load %arg4[%c0_4, %c0_5] : memref<64x1xf32, #tpu.memory_space<vmem>>, vector<64x1xf32>
    %6 = vector.broadcast %5 : vector<64x1xf32> to vector<64x256xf32>
    %7 = arith.addf %4, %6 : vector<64x256xf32>
    %cst_6 = arith.constant 2.000000e-01 : f32
    %8 = vector.broadcast %cst_6 : f32 to vector<64x256xf32>
    %9 = arith.mulf %8, %7 : vector<64x256xf32>
    %10 = arith.maximumf %7, %9 : vector<64x256xf32>
    %11 = arith.truncf %10 : vector<64x256xf32> to vector<64x256xbf16>
    %c0_7 = arith.constant 0 : index
    %c0_8 = arith.constant 0 : index
    %12 = vector.load %arg5[%c0_7, %c0_8] : memref<128x64xbf16, #tpu.memory_space<vmem>>, vector<128x64xbf16>
    %cst_9 = arith.constant dense<0.000000e+00> : vector<128x256xf32>
    %13 = tpu.matmul %12, %11, %cst_9 {dimension_numbers = #tpu.dot_dimension_numbers<[1], [0], [0], [1], [0, 0, 1, 1], [], []>} : vector<128x64xbf16>, vector<64x256xbf16>, vector<128x256xf32> -> vector<128x256xf32>
    %c0_10 = arith.constant 0 : index
    %c0_11 = arith.constant 0 : index
    %14 = vector.load %arg6[%c0_10, %c0_11] : memref<128x1xf32, #tpu.memory_space<vmem>>, vector<128x1xf32>
    %15 = vector.broadcast %14 : vector<128x1xf32> to vector<128x256xf32>
    %16 = arith.addf %13, %15 : vector<128x256xf32>
    %cst_12 = arith.constant 2.000000e-01 : f32
    %17 = vector.broadcast %cst_12 : f32 to vector<128x256xf32>
    %18 = arith.mulf %17, %16 : vector<128x256xf32>
    %19 = arith.maximumf %16, %18 : vector<128x256xf32>
    %20 = arith.truncf %19 : vector<128x256xf32> to vector<128x256xbf16>
    %c0_13 = arith.constant 0 : index
    %c0_14 = arith.constant 0 : index
    %21 = vector.load %arg7[%c0_13, %c0_14] : memref<1x128xbf16, #tpu.memory_space<vmem>>, vector<1x128xbf16>
    %cst_15 = arith.constant dense<0.000000e+00> : vector<1x256xf32>
    %22 = tpu.matmul %21, %20, %cst_15 {dimension_numbers = #tpu.dot_dimension_numbers<[1], [0], [0], [1], [0, 0, 1, 1], [], []>} : vector<1x128xbf16>, vector<128x256xbf16>, vector<1x256xf32> -> vector<1x256xf32>
    %c0_16 = arith.constant 0 : index
    %c0_17 = arith.constant 0 : index
    %c0_18 = arith.constant 0 : index
    %23 = vector.load %arg8[%c0_16, %c0_17, %c0_18] : memref<1x1x256xf32, #tpu.memory_space<vmem>>, vector<1x1x256xf32>
    %24 = vector.shape_cast %23 : vector<1x1x256xf32> to vector<1x256xf32>
    %25 = vector.shape_cast %22 : vector<1x256xf32> to vector<1x1x256xf32>
    tpu.vector_store %arg8[%c0_16, %c0_17, %c0_18], %25 {strides = array<i32>} : memref<1x1x256xf32, #tpu.memory_space<vmem>>, vector<1x1x256xf32>,
    return
  }
  func.func @transform_0(%arg0: i32, %arg1: i32) -> (i32, i32, i32) {
    %c0_i32 = arith.constant 0 : i32
    %c0_i32_0 = arith.constant 0 : i32
    return %arg0, %c0_i32, %arg1 : i32, i32, i32
  }
  func.func @transform_1(%arg0: i32, %arg1: i32) -> (i32, i32) {
    %c0_i32 = arith.constant 0 : i32
    %c0_i32_0 = arith.constant 0 : i32
    %c0_i32_1 = arith.constant 0 : i32
    return %c0_i32, %c0_i32_0 : i32, i32
  }
  func.func @transform_2(%arg0: i32, %arg1: i32) -> (i32, i32) {
    %c0_i32 = arith.constant 0 : i32
    %c0_i32_0 = arith.constant 0 : i32
    %c0_i32_1 = arith.constant 0 : i32
    return %c0_i32, %c0_i32_0 : i32, i32
  }
  func.func @transform_3(%arg0: i32, %arg1: i32) -> (i32, i32) {
    %c0_i32 = arith.constant 0 : i32
    %c0_i32_0 = arith.constant 0 : i32
    %c0_i32_1 = arith.constant 0 : i32
    return %c0_i32, %c0_i32_0 : i32, i32
  }
  func.func @transform_4(%arg0: i32, %arg1: i32) -> (i32, i32) {
    %c0_i32 = arith.constant 0 : i32
    %c0_i32_0 = arith.constant 0 : i32
    %c0_i32_1 = arith.constant 0 : i32
    return %c0_i32, %c0_i32_0 : i32, i32
  }
  func.func @transform_5(%arg0: i32, %arg1: i32) -> (i32, i32) {
    %c0_i32 = arith.constant 0 : i32
    %c0_i32_0 = arith.constant 0 : i32
    %c0_i32_1 = arith.constant 0 : i32
    return %c0_i32, %c0_i32_0 : i32, i32
  }
  func.func @transform_6(%arg0: i32, %arg1: i32) -> (i32, i32, i32) {
    %c0_i32 = arith.constant 0 : i32
    %c0_i32_0 = arith.constant 0 : i32
    return %arg0, %c0_i32, %arg1 : i32, i32, i32
  }
}

</mosaic_0001>

<bundles_post_ra>
// kernel: pixel_discriminator_forward.2
= control target key start
LH: loop header
LB: loop body
LE: loop exit
PB: predicated region body
PF: predicated region fallthrough
CT: control target
= control target key end

     0   :  { %s1163_s18 = smov 0   ;;  %s1165_s19 = smov 0   ;;  %s1355_s0 = inlined_call_operand.vmem [shape: f32[2,4,256], index: 0, kind: input, shape index: {}]   ;;  %s1356_s1 = inlined_call_operand.vmem [shape: bf16[64,4], index: 1, kind: input, shape index: {}]   ;;  %s1357_s2 = inlined_call_operand.vmem [shape: f32[64,1], index: 2, kind: input, shape index: {}]   ;;  %s1358_s3 = inlined_call_operand.vmem [shape: bf16[128,64], index: 3, kind: input, shape index: {}]   ;;  %s1359_s4 = inlined_call_operand.vmem [shape: f32[2,1,128,1], index: 4, kind: output, shape index: {0}]   ;;  %s1360_s5 = inlined_call_operand.vmem [shape: f32[2,1,128,1], index: 5, kind: output, shape index: {1}]  }
   0x1   :  { %s1167_s20 = smov 0  }
   0x2 LB: > { %s28_s21 = sadd.s32 1, %s1126_s19  ;;  %p976_p0 = scmp.ge.s32.totalorder %s1130_s20, 1  ;;  %s1130_s20 = sphi %s1167_s20, %s16_s20   ;;  %s1126_s19 = sphi %s1165_s19, %s1362_s19   ;;  %s1122_s18 = sphi %s1163_s18, %s1361_s18  }
   0x3   : > { %p30_p1 = scmp.ge.s32.totalorder %s28_s21, 2  ;;  %p213_p2 = scmp.lt.s32.totalorder %s1130_s20, 3 }
   0x5   : > { %s1364_s21 = smov (%p30_p1, %s28_s21), 0  ;;  %p214_p3 = pnand %p976_p0, %p213_p2 }
   0x6   : > { %p259_p4 = scmp.lt.s32.totalorder (!%p214_p3), %s1122_s18, 1 }
   0x7   : > { %217 = sbr.rel (%p214_p3) target bundleno = 584 (0x248), region = 36 }
   0xc   : > { %v310_v0 = vld [vmem:[%s1357_s2 + $0x30] sm:$0xff]  ;;  %v1132_v1 = vmov 0   ;;  %v308_v2 = vld [vmem:[%s1357_s2 + $0x20] sm:$0xff]  ;;  %s1366_s18 = smov (!%p259_p4, %s1122_s18), 1  ;;  %v311_v4 = vld [vmem:[%s1357_s2 + $0x38] sm:$0xff]  ;;  %vm385_vm0 = vcmask 1041408  }
   0xd   : > { %1105 = vset.pattern.permute.xlu0 %v1132_v1  ;;  %1106 = vset.pattern.permute.xlu1 %v1132_v1  ;;  %s1057_s26 = sshll.u32 %s1366_s18, 3  ;;  %v309_v5 = vld [vmem:[%s1357_s2 + $0x28] sm:$0xff]  ;;  %v304_v10 = vld [vmem:[%s1357_s2] sm:$0xff]  ;;  %vm372_vm1 = vcmask 31744   ;;  %v306_v16 = vld [vmem:[%s1357_s2 + $0x10] sm:$0xff]  ;;  %vm546_vm2 = vcmask 523264  }
   0xe   : > { %344 = vperm.xlu0 %1105, %v310_v0   ;;  %334 = vperm.xlu1 %1106, %v308_v2   ;;  %s266_s29 = scalar_lea.vmem %s1355_s0, %s1057_s26  ;;  %v305_v11 = vld [vmem:[%s1357_s2 + $0x8] sm:$0xff]  ;;  %v1060_v14 = vld [vmem:[%s1356_s1] sm:$0xff]  ;;  %v307_v17 = vld [vmem:[%s1357_s2 + $0x18] sm:$0xff]  ;;  %s1058_s24 = sshll.u32 %s1366_s18, 7  ;;  %vm717_vm3 = vcmask 7168  }
   0xf   : > { %1107 = vset.pattern.permute.xlu2 %v1132_v1  ;;  %v287_v3 = vld [vmem:[%s266_s29] sm:$0xff]  ;;  %v1061_v15 = vld [vmem:[%s1356_s1 + $0x8] sm:$0xff]  ;;  %v1062_v18 = vld [vmem:[%s1356_s1 + $0x10] sm:$0xff]  ;;  %s1275_s27 = scalar_lea.vmem %s1359_s4, %s1058_s24  ;;  %s1282_s30 = scalar_lea.vmem %s1360_s5, %s1058_s24 }
  0x10   : > { %289 = vst [vmem:[#allocation1] ss:$2 sm:$0xff] %v287_v3  ;;  %324 = vperm.xlu2 %1107, %v306_v16   ;;  %v1063_v19 = vld [vmem:[%s1356_s1 + $0x18] sm:$0xff] }
  0x16   : > { %349 = vperm.xlu0 %1105, %v311_v4   ;;  %339 = vperm.xlu1 %1106, %v309_v5  }
  0x17   : > { %v290_v6 = vld.sshfl [vmem:[#allocation1] sm:$0xff pattern:$0x75316420]  ;;  %v291_v7 = vld.sshfl [vmem:[#allocation1 + $0x8] sm:$0xff pattern:$0x75316420] }
  0x18   : > { %v294_v8 = vpack.c.bf16 %v290_v6, %v290_v6  ;;  %v295_v9 = vpack.c.bf16 %v291_v7, %v291_v7  ;;  %329 = vperm.xlu2 %1107, %v307_v17  }
  0x1a   : > { %v387_v12 = vsel %vm385_vm0, %v294_v8, 0  ;;  %v390_v13 = vsel %vm385_vm0, %v295_v9, 0 }
  0x1b   : > { %399 = vmatpush.bf16.msra.mxu0 %v387_v12  ;;  %428 = vmatpush.bf16.msra.mxu1 %v390_v13 }
  0x1e   : > { %314 = vperm.xlu0 %1105, %v304_v10   ;;  %319 = vperm.xlu1 %1106, %v305_v11  }
  0x1f   : > { %999 = vmatmul.msk.bf16.vlgmr.msra.gmra.mxu0 %vm372_vm1, %v1060_v14  ;;  %1003 = vmatmul.msk.bf16.vlgmr.msra.gmra.mxu1 %vm372_vm1, %v1060_v14 }
  0x2f   : > { %1000 = vmatmul.msk.bf16.gmra.mxu0 %vm372_vm1, %v1061_v15  ;;  %1004 = vmatmul.msk.bf16.gmra.mxu1 %vm372_vm1, %v1061_v15 }
  0x3f   : > { %1001 = vmatmul.msk.bf16.gmra.mxu0 %vm372_vm1, %v1062_v18  ;;  %1005 = vmatmul.msk.bf16.gmra.mxu1 %vm372_vm1, %v1062_v18 }
  0x4f   : > { %1002 = vmatmul.msk.bf16.gmra.mxu0 %vm372_vm1, %v1063_v19  ;;  %1006 = vmatmul.msk.bf16.gmra.mxu1 %vm372_vm1, %v1063_v19 }
  0x6a   : > { %v325_v34 = vpop.permute.xlu2 %324 }
  0x72   : > { %v330_v41 = vpop.permute.xlu2 %329 }
  0x80   : > { %v335_v30 = vpop.permute.xlu1 %334  ;;  %v345_v33 = vpop.permute.xlu0 %344 }
  0x88   : > { %v340_v37 = vpop.permute.xlu1 %339  ;;  %v350_v38 = vpop.permute.xlu0 %349 }
  0x90   : > { %v320_v52 = vpop.permute.xlu1 %319  ;;  %v315_v1 = vpop.permute.xlu0 %314 }
  0x9c   : > { %v401_v20 = vpop.f32.mrf.mxu0  ;;  %v430_v21 = vpop.f32.mrf.mxu1 }
  0x9d   : > { %v402_v12 = vadd.f32 %v401_v20, %v315_v1  ;;  %v431_v15 = vadd.f32 %v430_v21, %v315_v1 }
  0x9f   : > { %v451_v20 = vmul.f32 0.2, %v431_v15 }
  0xa4   : > { %v403_v22 = vpop.f32.mrf.mxu0  ;;  %v432_v23 = vpop.f32.mrf.mxu1 }
  0xa5   : > { %v404_v2 = vadd.f32 %v403_v22, %v320_v52  ;;  %v433_v9 = vadd.f32 %v432_v23, %v320_v52 }
  0xa7   : > { %v452_v18 = vmul.f32 0.2, %v404_v2 }
  0xac   : > { %v406_v24 = vpop.f32.mrf.mxu0  ;;  %v435_v25 = vpop.f32.mrf.mxu1 }
  0xad   : > { %v407_v57 = vadd.f32 %v406_v24, %v325_v34  ;;  %v436_v3 = vadd.f32 %v435_v25, %v325_v34  ;;  %v453_v24 = vmul.f32 0.2, %v433_v9 }
  0xaf   : > { %v454_v13 = vmul.f32 0.2, %v407_v57  ;;  %v455_v16 = vmul.f32 0.2, %v436_v3 }
  0xb1   : > { %v470_v23 = vmax.f32 %v407_v57, %v454_v13 }
  0xb4   : > { %v408_v26 = vpop.f32.mrf.mxu0  ;;  %v437_v27 = vpop.f32.mrf.mxu1 }
  0xb5   : > { %v409_v53 = vadd.f32 %v408_v26, %v330_v41  ;;  %v438_v58 = vadd.f32 %v437_v27, %v330_v41  ;;  %v450_v27 = vmul.f32 0.2, %v402_v12  ;;  %v1069_v41 = vld [vmem:[%s1358_s3 + $0x28] sm:$0xff] }
  0xb7   : > { %v456_v5 = vmul.f32 0.2, %v409_v53  ;;  %v457_v10 = vmul.f32 0.2, %v438_v58 }
  0xb9   : > { %v472_v19 = vmax.f32 %v409_v53, %v456_v5  ;;  %v473_v25 = vmax.f32 %v438_v58, %v457_v10 }
  0xbb   : > { %v484_v21 = vpack.c.bf16 %v472_v19, %v470_v23 }
  0xbc   : > { %v411_v28 = vpop.f32.mrf.mxu0  ;;  %v440_v29 = vpop.f32.mrf.mxu1 }
  0xbd   : > { %v412_v43 = vadd.f32 %v411_v28, %v335_v30  ;;  %v441_v51 = vadd.f32 %v440_v29, %v335_v30  ;;  %v471_v28 = vmax.f32 %v436_v3, %v455_v16  ;;  %v468_v29 = vmax.f32 %v404_v2, %v452_v18 }
  0xbe   : > { %v469_v30 = vmax.f32 %v433_v9, %v453_v24 }
  0xbf   : > { %v458_v59 = vmul.f32 0.2, %v412_v43  ;;  %v459_v4 = vmul.f32 0.2, %v441_v51 }
  0xc1   : > { %v474_v14 = vmax.f32 %v412_v43, %v458_v59  ;;  %v475_v17 = vmax.f32 %v441_v51, %v459_v4  ;;  %v1071_v43 = vld [vmem:[%s1358_s3 + $0x38] sm:$0xff] }
  0xc4   : > { %v413_v31 = vpop.f32.mrf.mxu0  ;;  %v442_v32 = vpop.f32.mrf.mxu1 }
  0xc5   : > { %v414_v42 = vadd.f32 %v413_v31, %v340_v37  ;;  %v443_v44 = vadd.f32 %v442_v32, %v340_v37  ;;  %v485_v31 = vpack.c.bf16 %v473_v25, %v471_v28  ;;  %v466_v32 = vmax.f32 %v402_v12, %v450_v27  ;;  %v1066_v37 = vld [vmem:[%s1358_s3 + $0x10] sm:$0xff] }
  0xc7   : > { %v460_v54 = vmul.f32 0.2, %v414_v42  ;;  %v461_v60 = vmul.f32 0.2, %v443_v44  ;;  %v482_v34 = vpack.c.bf16 %v468_v29, %v466_v32 }
  0xc9   : > { %v476_v6 = vmax.f32 %v414_v42, %v460_v54  ;;  %v477_v11 = vmax.f32 %v443_v44, %v461_v60  ;;  %v1070_v42 = vld [vmem:[%s1358_s3 + $0x30] sm:$0xff] }
  0xcb   : > { %v486_v22 = vpack.c.bf16 %v476_v6, %v474_v14  ;;  %v487_v26 = vpack.c.bf16 %v477_v11, %v475_v17 }
  0xcc   : > { %v416_v35 = vpop.f32.mrf.mxu0  ;;  %v445_v36 = vpop.f32.mrf.mxu1 }
  0xcd   : > { %v417_v39 = vadd.f32 %v416_v35, %v345_v33  ;;  %v446_v40 = vadd.f32 %v445_v36, %v345_v33  ;;  %v467_v33 = vmax.f32 %v431_v15, %v451_v20  ;;  %v1064_v36 = vld [vmem:[%s1358_s3] sm:$0xff] }
  0xcf   : > { %v462_v47 = vmul.f32 0.2, %v417_v39  ;;  %v463_v48 = vmul.f32 0.2, %v446_v40  ;;  %v483_v35 = vpack.c.bf16 %v469_v30, %v467_v33 }
  0xd1   : > { %v478_v61 = vmax.f32 %v417_v39, %v462_v47  ;;  %v479_v62 = vmax.f32 %v446_v40, %v463_v48  ;;  %v1067_v39 = vld [vmem:[%s1358_s3 + $0x18] sm:$0xff]  ;;  %v1068_v40 = vld [vmem:[%s1358_s3 + $0x20] sm:$0xff] }
  0xd4   : > { %v418_v45 = vpop.f32.mrf.mxu0  ;;  %v447_v46 = vpop.f32.mrf.mxu1 }
  0xd5   : > { %v419_v49 = vadd.f32 %v418_v45, %v350_v38  ;;  %v448_v50 = vadd.f32 %v447_v46, %v350_v38  ;;  %v1065_v38 = vld [vmem:[%s1358_s3 + $0x8] sm:$0xff] }
  0xd7   : > { %v464_v55 = vmul.f32 0.2, %v419_v49  ;;  %v465_v56 = vmul.f32 0.2, %v448_v50 }
  0xd9   : > { %v480_v63 = vmax.f32 %v419_v49, %v464_v55  ;;  %v481_v0 = vmax.f32 %v448_v50, %v465_v56 }
  0xdb   : > { %v488_v7 = vpack.c.bf16 %v480_v63, %v478_v61  ;;  %v489_v8 = vpack.c.bf16 %v481_v0, %v479_v62 }
  0xdd   : > { %575 = vmatpush.bf16.msrb.mxu0 %v488_v7  ;;  %1072 = vmatpush.bf16.msra.mxu2 %v488_v7 }
  0xde   : > { %624 = vmatpush.bf16.msrb.mxu1 %v489_v8  ;;  %1076 = vmatpush.bf16.msra.mxu3 %v489_v8 }
  0xe1   : > { %576 = vmatpush.bf16.msrb.mxu0 %v486_v22  ;;  %1073 = vmatpush.bf16.msra.mxu2 %v486_v22 }
  0xe2   : > { %625 = vmatpush.bf16.msrb.mxu1 %v487_v26  ;;  %1077 = vmatpush.bf16.msra.mxu3 %v487_v26 }
  0xe5   : > { %577 = vmatpush.bf16.msrb.mxu0 %v484_v21  ;;  %1074 = vmatpush.bf16.msra.mxu2 %v484_v21 }
  0xe6   : > { %626 = vmatpush.bf16.msrb.mxu1 %v485_v31  ;;  %1078 = vmatpush.bf16.msra.mxu3 %v485_v31 }
  0xe9   : > { %578 = vmatpush.bf16.msrb.mxu0 %v482_v34  ;;  %1075 = vmatpush.bf16.msra.mxu2 %v482_v34 }
  0xea   : > { %627 = vmatpush.bf16.msrb.mxu1 %v483_v35  ;;  %1079 = vmatpush.bf16.msra.mxu3 %v483_v35 }
  0xec   : > { %1039 = vmatmul.msk.bf16.vlgmr.msrb.gmra.mxu0 %vm546_vm2, %v1064_v36  ;;  %1041 = vmatmul.msk.bf16.vlgmr.msra.gmra.mxu2 %vm546_vm2, %v1066_v37 }
  0xed   : > { %1047 = vmatmul.msk.bf16.vlgmr.msrb.gmra.mxu1 %vm546_vm2, %v1064_v36  ;;  %1049 = vmatmul.msk.bf16.vlgmr.msra.gmra.mxu3 %vm546_vm2, %v1066_v37 }
  0xfc   : > { %1040 = vmatmul.msk.bf16.gmra.mxu0 %vm546_vm2, %v1065_v38  ;;  %1042 = vmatmul.msk.bf16.gmra.mxu2 %vm546_vm2, %v1067_v39 }
  0xfd   : > { %1048 = vmatmul.msk.bf16.gmra.mxu1 %vm546_vm2, %v1065_v38  ;;  %1050 = vmatmul.msk.bf16.gmra.mxu3 %vm546_vm2, %v1067_v39 }
 0x10c   : > { %1043 = vmatmul.msk.bf16.gmra.mxu2 %vm546_vm2, %v1068_v40 }
 0x10d   : > { %1051 = vmatmul.msk.bf16.gmra.mxu3 %vm546_vm2, %v1068_v40 }
 0x11c   : > { %1044 = vmatmul.msk.bf16.gmra.mxu2 %vm546_vm2, %v1069_v41 }
 0x11d   : > { %1052 = vmatmul.msk.bf16.gmra.mxu3 %vm546_vm2, %v1069_v41 }
 0x12c   : > { %1045 = vmatmul.msk.bf16.gmra.mxu2 %vm546_vm2, %v1070_v42 }
 0x12d   : > { %1053 = vmatmul.msk.bf16.gmra.mxu3 %vm546_vm2, %v1070_v42 }
 0x13c   : > { %1046 = vmatmul.msk.bf16.gmra.mxu2 %vm546_vm2, %v1071_v43 }
 0x13d   : > { %1054 = vmatmul.msk.bf16.gmra.mxu3 %vm546_vm2, %v1071_v43 }
 0x169   : > { %v580_v44 = vpop.f32.mrf.mxu0 }
 0x16a   : > { %v629_v45 = vpop.f32.mrf.mxu1  ;;  %v734_v47 = vmul.f32 %v580_v44, %v580_v44 }
 0x16b   : > { %v669_v46 = vadd.f32 %v629_v45, %v580_v44  ;;  %v735_v48 = vmul.f32 %v629_v45, %v629_v45 }
 0x16d   : > { %670 = vadd.xlane.f32.xlu2 %v669_v46  ;;  %v766_v52 = vadd.f32 %v735_v48, %v734_v47 }
 0x16f   : > { %v590_v49 = vpop.f32.mrf.mxu2 }
 0x170   : > { %v639_v50 = vpop.f32.mrf.mxu3  ;;  %v742_v55 = vmul.f32 %v590_v49, %v590_v49 }
 0x171   : > { %v582_v51 = vpop.f32.mrf.mxu0  ;;  %v743_v56 = vmul.f32 %v639_v50, %v639_v50  ;;  %v681_v61 = vadd.f32 %v639_v50, %v590_v49 }
 0x172   : > { %v631_v53 = vpop.f32.mrf.mxu1  ;;  %v736_v0 = vmul.f32 %v582_v51, %v582_v51 }
 0x173   : > { %v672_v54 = vadd.f32 %v631_v53, %v582_v51  ;;  %v778_v62 = vadd.f32 %v743_v56, %v742_v55  ;;  %v737_v1 = vmul.f32 %v631_v53, %v631_v53 }
 0x175   : > { %767 = vadd.xlane.f32.xlu2 %v766_v52  ;;  %673 = vadd.xlane.f32.xlu0 %v672_v54  ;;  %v769_v9 = vadd.f32 %v737_v1, %v736_v0 }
 0x177   : > { %v592_v57 = vpop.f32.mrf.mxu2 }
 0x178   : > { %v641_v58 = vpop.f32.mrf.mxu3  ;;  %v744_v3 = vmul.f32 %v592_v57, %v592_v57 }
 0x179   : > { %v585_v59 = vpop.f32.mrf.mxu0  ;;  %v745_v4 = vmul.f32 %v641_v58, %v641_v58  ;;  %v684_v18 = vadd.f32 %v641_v58, %v592_v57 }
 0x17a   : > { %v634_v60 = vpop.f32.mrf.mxu1  ;;  %v738_v11 = vmul.f32 %v585_v59, %v585_v59 }
 0x17b   : > { %v675_v63 = vadd.f32 %v634_v60, %v585_v59  ;;  %v781_v10 = vadd.f32 %v745_v4, %v744_v3  ;;  %v739_v12 = vmul.f32 %v634_v60, %v634_v60 }
 0x17d   : > { %682 = vadd.xlane.f32.xlu2 %v681_v61  ;;  %779 = vadd.xlane.f32.xlu0 %v778_v62  ;;  %v772_v17 = vadd.f32 %v739_v12, %v738_v11 }
 0x17e   : > { %676 = vadd.xlane.f32.xlu1 %v675_v63 }
 0x17f   : > { %v595_v2 = vpop.f32.mrf.mxu2 }
 0x180   : > { %v644_v5 = vpop.f32.mrf.mxu3  ;;  %v746_v13 = vmul.f32 %v595_v2, %v595_v2 }
 0x181   : > { %v587_v6 = vpop.f32.mrf.mxu0  ;;  %v747_v14 = vmul.f32 %v644_v5, %v644_v5  ;;  %v687_v29 = vadd.f32 %v644_v5, %v595_v2 }
 0x182   : > { %v636_v7 = vpop.f32.mrf.mxu1  ;;  %v740_v22 = vmul.f32 %v587_v6, %v587_v6 }
 0x183   : > { %v678_v8 = vadd.f32 %v636_v7, %v587_v6  ;;  %v784_v19 = vadd.f32 %v747_v14, %v746_v13  ;;  %v741_v24 = vmul.f32 %v636_v7, %v636_v7 }
 0x185   : > { %770 = vadd.xlane.f32.xlu0 %v769_v9  ;;  %679 = vadd.xlane.f32.xlu2 %v678_v8  ;;  %v775_v20 = vadd.f32 %v741_v24, %v740_v22 }
 0x186   : > { %782 = vadd.xlane.f32.xlu1 %v781_v10 }
 0x187   : > { %v597_v15 = vpop.f32.mrf.mxu2 }
 0x188   : > { %v646_v16 = vpop.f32.mrf.mxu3  ;;  %v748_v25 = vmul.f32 %v597_v15, %v597_v15 }
 0x189   : > { %v749_v26 = vmul.f32 %v646_v16, %v646_v16  ;;  %v690_v33 = vadd.f32 %v646_v16, %v597_v15 }
 0x18b   : > { %v787_v28 = vadd.f32 %v749_v26, %v748_v25 }
 0x18d   : > { %685 = vadd.xlane.f32.xlu0 %v684_v18  ;;  %785 = vadd.xlane.f32.xlu2 %v784_v19 }
 0x18e   : > { %773 = vadd.xlane.f32.xlu1 %v772_v17 }
 0x18f   : > { %v600_v27 = vpop.f32.mrf.mxu2 }
 0x190   : > { %v649_v23 = vpop.f32.mrf.mxu3  ;;  %v750_v30 = vmul.f32 %v600_v27, %v600_v27 }
 0x191   : > { %v751_v31 = vmul.f32 %v649_v23, %v649_v23  ;;  %v693_v34 = vadd.f32 %v649_v23, %v600_v27 }
 0x193   : > { %v790_v35 = vadd.f32 %v751_v31, %v750_v30 }
 0x195   : > { %776 = vadd.xlane.f32.xlu2 %v775_v20  ;;  %788 = vadd.xlane.f32.xlu0 %v787_v28 }
 0x196   : > { %688 = vadd.xlane.f32.xlu1 %v687_v29 }
 0x197   : > { %v602_v21 = vpop.f32.mrf.mxu2 }
 0x198   : > { %v651_v32 = vpop.f32.mrf.mxu3  ;;  %v752_v36 = vmul.f32 %v602_v21, %v602_v21 }
 0x199   : > { %v753_v37 = vmul.f32 %v651_v32, %v651_v32  ;;  %v696_v44 = vadd.f32 %v651_v32, %v602_v21 }
 0x19b   : > { %v793_v42 = vadd.f32 %v753_v37, %v752_v36 }
 0x19d   : > { %691 = vadd.xlane.f32.xlu2 %v690_v33  ;;  %694 = vadd.xlane.f32.xlu0 %v693_v34 }
 0x19e   : > { %791 = vadd.xlane.f32.xlu1 %v790_v35 }
 0x19f   : > { %v605_v38 = vpop.f32.mrf.mxu2 }
 0x1a0   : > { %v754_v39 = vmul.f32 %v605_v38, %v605_v38  ;;  %v654_v40 = vpop.f32.mrf.mxu3 }
 0x1a1   : > { %v755_v41 = vmul.f32 %v654_v40, %v654_v40  ;;  %v699_v50 = vadd.f32 %v654_v40, %v605_v38 }
 0x1a3   : > { %v796_v43 = vadd.f32 %v755_v41, %v754_v39 }
 0x1a5   : > { %794 = vadd.xlane.f32.xlu2 %v793_v42  ;;  %797 = vadd.xlane.f32.xlu0 %v796_v43 }
 0x1a6   : > { %697 = vadd.xlane.f32.xlu1 %v696_v44 }
 0x1a7   : > { %v607_v45 = vpop.f32.mrf.mxu2 }
 0x1a8   : > { %v756_v46 = vmul.f32 %v607_v45, %v607_v45  ;;  %v656_v47 = vpop.f32.mrf.mxu3 }
 0x1a9   : > { %v757_v48 = vmul.f32 %v656_v47, %v656_v47  ;;  %v702_v49 = vadd.f32 %v656_v47, %v607_v45 }
 0x1ab   : > { %v799_v51 = vadd.f32 %v757_v48, %v756_v46 }
 0x1ad   : > { %703 = vadd.xlane.f32.xlu0 %v702_v49  ;;  %700 = vadd.xlane.f32.xlu2 %v699_v50 }
 0x1ae   : > { %800 = vadd.xlane.f32.xlu1 %v799_v51 }
 0x1af   : > { %v610_v52 = vpop.f32.mrf.mxu2 }
 0x1b0   : > { %v758_v53 = vmul.f32 %v610_v52, %v610_v52  ;;  %v659_v54 = vpop.f32.mrf.mxu3 }
 0x1b1   : > { %v759_v55 = vmul.f32 %v659_v54, %v659_v54  ;;  %v705_v57 = vadd.f32 %v659_v54, %v610_v52 }
 0x1b3   : > { %v802_v56 = vadd.f32 %v759_v55, %v758_v53 }
 0x1b5   : > { %803 = vadd.xlane.f32.xlu2 %v802_v56 }
 0x1b6   : > { %706 = vadd.xlane.f32.xlu1 %v705_v57 }
 0x1b7   : > { %v612_v58 = vpop.f32.mrf.mxu2 }
 0x1b8   : > { %v661_v59 = vpop.f32.mrf.mxu3  ;;  %v760_v0 = vmul.f32 %v612_v58, %v612_v58 }
 0x1b9   : > { %v708_v60 = vadd.f32 %v661_v59, %v612_v58  ;;  %v761_v1 = vmul.f32 %v661_v59, %v661_v59 }
 0x1bb   : > { %v805_v5 = vadd.f32 %v761_v1, %v760_v0 }
 0x1bd   : > { %709 = vadd.xlane.f32.xlu2 %v708_v60 }
 0x1bf   : > { %v615_v61 = vpop.f32.mrf.mxu2 }
 0x1c0   : > { %v664_v62 = vpop.f32.mrf.mxu3  ;;  %v762_v9 = vmul.f32 %v615_v61, %v615_v61 }
 0x1c1   : > { %v711_v63 = vadd.f32 %v664_v62, %v615_v61  ;;  %v763_v10 = vmul.f32 %v664_v62, %v664_v62 }
 0x1c3   : > { %712 = vadd.xlane.f32.xlu0 %v711_v63  ;;  %v808_v11 = vadd.f32 %v763_v10, %v762_v9 }
 0x1c7   : > { %v617_v2 = vpop.f32.mrf.mxu2 }
 0x1c8   : > { %v764_v3 = vmul.f32 %v617_v2, %v617_v2  ;;  %v666_v4 = vpop.f32.mrf.mxu3 }
 0x1c9   : > { %v714_v6 = vadd.f32 %v666_v4, %v617_v2  ;;  %v765_v7 = vmul.f32 %v666_v4, %v666_v4 }
 0x1cb   : > { %806 = vadd.xlane.f32.xlu0 %v805_v5  ;;  %715 = vadd.xlane.f32.xlu1 %v714_v6  ;;  %v811_v8 = vadd.f32 %v765_v7, %v764_v3 }
 0x1cd   : > { %812 = vadd.xlane.f32.xlu2 %v811_v8 }
 0x1d3   : > { %809 = vadd.xlane.f32.xlu1 %v808_v11 }
 0x1e0   : > { %v671_v12 = vpop.xlane.xlu2 %670 }
 0x1e1   : > { %718 = vst.msk [vmem:[%s1275_s27] sm:$0xff] %vm717_vm3, %v671_v12 }
 0x1e8   : > { %v768_v13 = vpop.xlane.xlu2 %767  ;;  %v674_v14 = vpop.xlane.xlu0 %673 }
 0x1e9   : > { %814 = vst.msk [vmem:[%s1282_s30] sm:$0xff] %vm717_vm3, %v768_v13 }
 0x1ea   : > { %719 = vst.msk [vmem:[%s1275_s27 + $0x8] sm:$0xff] %vm717_vm3, %v674_v14 }
 0x1f0   : > { %v683_v15 = vpop.xlane.xlu2 %682  ;;  %v780_v16 = vpop.xlane.xlu0 %779 }
 0x1f1   : > { %722 = vst.msk [vmem:[%s1275_s27 + $0x20] sm:$0xff] %vm717_vm3, %v683_v15  ;;  %v677_v17 = vpop.xlane.xlu1 %676 }
 0x1f2   : > { %818 = vst.msk [vmem:[%s1282_s30 + $0x20] sm:$0xff] %vm717_vm3, %v780_v16 }
 0x1f3   : > { %720 = vst.msk [vmem:[%s1275_s27 + $0x10] sm:$0xff] %vm717_vm3, %v677_v17 }
 0x1f8   : > { %v771_v18 = vpop.xlane.xlu0 %770  ;;  %v680_v19 = vpop.xlane.xlu2 %679 }
 0x1f9   : > { %815 = vst.msk [vmem:[%s1282_s30 + $0x8] sm:$0xff] %vm717_vm3, %v771_v18  ;;  %v783_v22 = vpop.xlane.xlu1 %782 }
 0x1fa   : > { %721 = vst.msk [vmem:[%s1275_s27 + $0x18] sm:$0xff] %vm717_vm3, %v680_v19 }
 0x1fb   : > { %819 = vst.msk [vmem:[%s1282_s30 + $0x28] sm:$0xff] %vm717_vm3, %v783_v22 }
 0x200   : > { %v686_v24 = vpop.xlane.xlu0 %685  ;;  %v786_v25 = vpop.xlane.xlu2 %785 }
 0x201   : > { %723 = vst.msk [vmem:[%s1275_s27 + $0x28] sm:$0xff] %vm717_vm3, %v686_v24  ;;  %v774_v26 = vpop.xlane.xlu1 %773 }
 0x202   : > { %820 = vst.msk [vmem:[%s1282_s30 + $0x30] sm:$0xff] %vm717_vm3, %v786_v25 }
 0x203   : > { %816 = vst.msk [vmem:[%s1282_s30 + $0x10] sm:$0xff] %vm717_vm3, %v774_v26 }
 0x208   : > { %v777_v27 = vpop.xlane.xlu2 %776  ;;  %v789_v23 = vpop.xlane.xlu0 %788 }
 0x209   : > { %817 = vst.msk [vmem:[%s1282_s30 + $0x18] sm:$0xff] %vm717_vm3, %v777_v27  ;;  %v689_v20 = vpop.xlane.xlu1 %688 }
 0x20a   : > { %724 = vst.msk [vmem:[%s1275_s27 + $0x30] sm:$0xff] %vm717_vm3, %v689_v20 }
 0x20b   : > { %821 = vst.msk [vmem:[%s1282_s30 + $0x38] sm:$0xff] %vm717_vm3, %v789_v23 }
 0x210   : > { %v692_v28 = vpop.xlane.xlu2 %691  ;;  %v695_v29 = vpop.xlane.xlu0 %694 }
 0x211   : > { %725 = vst.msk [vmem:[%s1275_s27 + $0x38] sm:$0xff] %vm717_vm3, %v692_v28  ;;  %v792_v21 = vpop.xlane.xlu1 %791 }
 0x212   : > { %822 = vst.msk [vmem:[%s1282_s30 + $0x40] sm:$0xff] %vm717_vm3, %v792_v21 }
 0x213   : > { %726 = vst.msk [vmem:[%s1275_s27 + $0x40] sm:$0xff] %vm717_vm3, %v695_v29 }
 0x218   : > { %v795_v30 = vpop.xlane.xlu2 %794  ;;  %v798_v31 = vpop.xlane.xlu0 %797 }
 0x219   : > { %v698_v32 = vpop.xlane.xlu1 %697  ;;  %823 = vst.msk [vmem:[%s1282_s30 + $0x48] sm:$0xff] %vm717_vm3, %v795_v30 }
 0x21a   : > { %727 = vst.msk [vmem:[%s1275_s27 + $0x48] sm:$0xff] %vm717_vm3, %v698_v32 }
 0x21b   : > { %824 = vst.msk [vmem:[%s1282_s30 + $0x50] sm:$0xff] %vm717_vm3, %v798_v31 }
 0x220   : > { %v704_v33 = vpop.xlane.xlu0 %703  ;;  %v701_v34 = vpop.xlane.xlu2 %700 }
 0x221   : > { %729 = vst.msk [vmem:[%s1275_s27 + $0x58] sm:$0xff] %vm717_vm3, %v704_v33  ;;  %v801_v35 = vpop.xlane.xlu1 %800 }
 0x222   : > { %728 = vst.msk [vmem:[%s1275_s27 + $0x50] sm:$0xff] %vm717_vm3, %v701_v34 }
 0x223   : > { %825 = vst.msk [vmem:[%s1282_s30 + $0x58] sm:$0xff] %vm717_vm3, %v801_v35 }
 0x228   : > { %v804_v36 = vpop.xlane.xlu2 %803 }
 0x229   : > { %826 = vst.msk [vmem:[%s1282_s30 + $0x60] sm:$0xff] %vm717_vm3, %v804_v36  ;;  %v707_v37 = vpop.xlane.xlu1 %706 }
 0x22a   : > { %730 = vst.msk [vmem:[%s1275_s27 + $0x60] sm:$0xff] %vm717_vm3, %v707_v37 }
 0x230   : > { %v710_v38 = vpop.xlane.xlu2 %709 }
 0x231   : > { %731 = vst.msk [vmem:[%s1275_s27 + $0x68] sm:$0xff] %vm717_vm3, %v710_v38 }
 0x236   : > { %v713_v39 = vpop.xlane.xlu0 %712 }
 0x237   : > { %732 = vst.msk [vmem:[%s1275_s27 + $0x70] sm:$0xff] %vm717_vm3, %v713_v39 }
 0x23e   : > { %v807_v40 = vpop.xlane.xlu0 %806  ;;  %v716_v41 = vpop.xlane.xlu1 %715 }
 0x23f   : > { %827 = vst.msk [vmem:[%s1282_s30 + $0x68] sm:$0xff] %vm717_vm3, %v807_v40 }
 0x240   : > { %733 = vst.msk [vmem:[%s1275_s27 + $0x78] sm:$0xff] %vm717_vm3, %v716_v41  ;;  %v813_v42 = vpop.xlane.xlu2 %812 }
 0x241   : > { %829 = vst.msk [vmem:[%s1282_s30 + $0x78] sm:$0xff] %vm717_vm3, %v813_v42 }
 0x246   : > { %v810_v43 = vpop.xlane.xlu1 %809 }
 0x247   : > { %828 = vst.msk [vmem:[%s1282_s30 + $0x70] sm:$0xff] %vm717_vm3, %v810_v43 }
 0x248 PF: > { %s16_s20 = sadd.s32 1, %s1130_s20   ;;  %s1361_s18 = smov %s1126_s19 }
 0x249   : > { %p13_p5 = scmp.ge.s32.totalorder %s16_s20, 4   ;;  %s1362_s19 = smov %s1364_s21 }
 0x24b   :  { %15 = sbr.rel (!%p13_p5) target bundleno = 2 (0x2), region = 78 }

// kernel: pixel_discriminator_forward.3
= control target key start
LH: loop header
LB: loop body
LE: loop exit
PB: predicated region body
PF: predicated region fallthrough
CT: control target
= control target key end

     0   :  { %s1150_s21 = smov 0   ;;  %s1152_s22 = smov 0   ;;  %s1386_s0 = inlined_call_operand.vmem [shape: f32[2,4,256], index: 0, kind: input, shape index: {}]   ;;  %s1387_s1 = inlined_call_operand.vmem [shape: bf16[64,4], index: 1, kind: input, shape index: {}]   ;;  %s1388_s2 = inlined_call_operand.vmem [shape: f32[64,1], index: 2, kind: input, shape index: {}]   ;;  %s1389_s3 = inlined_call_operand.vmem [shape: bf16[128,64], index: 3, kind: input, shape index: {}]   ;;  %s1390_s4 = inlined_call_operand.vmem [shape: f32[128,1], index: 4, kind: input, shape index: {}]   ;;  %s1391_s5 = inlined_call_operand.vmem [shape: bf16[1,128], index: 5, kind: input, shape index: {}]   ;;  %s1392_s6 = inlined_call_operand.vmem [shape: f32[2,1,256], index: 6, kind: output, shape index: {}]  }
   0x1   :  { %s1154_s23 = smov 0  }
   0x2 LB: > { %s28_s24 = sadd.s32 1, %s1108_s22  ;;  %p971_p0 = scmp.ge.s32.totalorder %s1112_s23, 1  ;;  %s1112_s23 = sphi %s1154_s23, %s16_s23   ;;  %s1108_s22 = sphi %s1152_s22, %s1394_s22   ;;  %s1104_s21 = sphi %s1150_s21, %s1393_s21  }
   0x3   : > { %p30_p1 = scmp.ge.s32.totalorder %s28_s24, 2  ;;  %p233_p2 = scmp.lt.s32.totalorder %s1112_s23, 3 }
   0x5   : > { %s1396_s24 = smov (%p30_p1, %s28_s24), 0  ;;  %p234_p3 = pnand %p971_p0, %p233_p2 }
   0x6   : > { %p271_p4 = scmp.lt.s32.totalorder (!%p234_p3), %s1104_s21, 1 }
   0x7   : > { %237 = sbr.rel (%p234_p3) target bundleno = 661 (0x295), region = 44 }
   0xc   : > { %v313_v0 = vld [vmem:[%s1388_s2 + $0x30] sm:$0xff]  ;;  %v1114_v1 = vmov 0   ;;  %v311_v2 = vld [vmem:[%s1388_s2 + $0x20] sm:$0xff]  ;;  %s1398_s21 = smov (!%p271_p4, %s1104_s21), 1  ;;  %v314_v4 = vld [vmem:[%s1388_s2 + $0x38] sm:$0xff]  ;;  %vm388_vm0 = vcmask 1041408  }
   0xd   : > { %1087 = vset.pattern.permute.xlu0 %v1114_v1  ;;  %1088 = vset.pattern.permute.xlu1 %v1114_v1  ;;  %s1049_s29 = sshll.u32 %s1398_s21, 3  ;;  %v312_v5 = vld [vmem:[%s1388_s2 + $0x28] sm:$0xff]  ;;  %v307_v10 = vld [vmem:[%s1388_s2] sm:$0xff]  ;;  %vm375_vm1 = vcmask 31744   ;;  %v309_v15 = vld [vmem:[%s1388_s2 + $0x10] sm:$0xff]  ;;  %vm645_vm2 = vcmask 523264  }
   0xe   : > { %347 = vperm.xlu0 %1087, %v313_v0   ;;  %337 = vperm.xlu1 %1088, %v311_v2   ;;  %s278_s8 = scalar_lea.vmem %s1386_s0, %s1049_s29  ;;  %v308_v11 = vld [vmem:[%s1388_s2 + $0x8] sm:$0xff]  ;;  %v1050_v14 = vld [vmem:[%s1387_s1] sm:$0xff]  ;;  %v524_v16 = vld [vmem:[%s1390_s4 + $0x78] sm:$0xff]  ;;  %s974_s19 = sshll.u32 %s1398_s21, 1  ;;  %vm878_vm3 = vcmask 1040384  }
   0xf   : > { %1089 = vset.pattern.permute.xlu2 %v1114_v1  ;;  %v290_v3 = vld [vmem:[%s278_s8] sm:$0xff]  ;;  %v310_v18 = vld [vmem:[%s1388_s2 + $0x18] sm:$0xff]  ;;  %v519_v19 = vld [vmem:[%s1390_s4 + $0x50] sm:$0xff]  ;;  %s287_s26 = scalar_lea.vmem %s1392_s6, %s974_s19 }
  0x10   : > { %292 = vst [vmem:[#allocation1] ss:$2 sm:$0xff] %v290_v3  ;;  %327 = vperm.xlu2 %1089, %v309_v15   ;;  %v521_v17 = vld [vmem:[%s1390_s4 + $0x60] sm:$0xff]  ;;  %v520_v20 = vld [vmem:[%s1390_s4 + $0x58] sm:$0xff]  ;;  %v1051_v21 = vld [vmem:[%s1387_s1 + $0x8] sm:$0xff] }
  0x11   : > { %v523_v22 = vld [vmem:[%s1390_s4 + $0x70] sm:$0xff]  ;;  %v518_v23 = vld [vmem:[%s1390_s4 + $0x48] sm:$0xff]  ;;  %v513_v26 = vld [vmem:[%s1390_s4 + $0x20] sm:$0xff] }
  0x12   : > { %v515_v24 = vld [vmem:[%s1390_s4 + $0x30] sm:$0xff]  ;;  %v522_v25 = vld [vmem:[%s1390_s4 + $0x68] sm:$0xff]  ;;  %v517_v29 = vld [vmem:[%s1390_s4 + $0x40] sm:$0xff] }
  0x13   : > { %v514_v27 = vld [vmem:[%s1390_s4 + $0x28] sm:$0xff]  ;;  %v1052_v28 = vld [vmem:[%s1387_s1 + $0x10] sm:$0xff]  ;;  %v512_v30 = vld [vmem:[%s1390_s4 + $0x18] sm:$0xff] }
  0x14   : > { %v509_v31 = vld [vmem:[%s1390_s4] sm:$0xff]  ;;  %v516_v32 = vld [vmem:[%s1390_s4 + $0x38] sm:$0xff]  ;;  %v511_v34 = vld [vmem:[%s1390_s4 + $0x10] sm:$0xff] }
  0x15   : > { %v1053_v33 = vld [vmem:[%s1387_s1 + $0x18] sm:$0xff]  ;;  %v510_v35 = vld [vmem:[%s1390_s4 + $0x8] sm:$0xff] }
  0x16   : > { %352 = vperm.xlu0 %1087, %v314_v4   ;;  %342 = vperm.xlu1 %1088, %v312_v5  }
  0x17   : > { %v293_v6 = vld.sshfl [vmem:[#allocation1] sm:$0xff pattern:$0x75316420]  ;;  %v294_v7 = vld.sshfl [vmem:[#allocation1 + $0x8] sm:$0xff pattern:$0x75316420] }
  0x18   : > { %v297_v8 = vpack.c.bf16 %v293_v6, %v293_v6  ;;  %v298_v9 = vpack.c.bf16 %v294_v7, %v294_v7  ;;  %332 = vperm.xlu2 %1089, %v310_v18  }
  0x1a   : > { %v390_v12 = vsel %vm388_vm0, %v297_v8, 0  ;;  %v393_v13 = vsel %vm388_vm0, %v298_v9, 0 }
  0x1b   : > { %402 = vmatpush.bf16.msra.mxu0 %v390_v12  ;;  %431 = vmatpush.bf16.msra.mxu1 %v393_v13 }
  0x1e   : > { %317 = vperm.xlu0 %1087, %v307_v10   ;;  %322 = vperm.xlu1 %1088, %v308_v11  }
  0x1f   : > { %991 = vmatmul.msk.bf16.vlgmr.msra.gmra.mxu0 %vm375_vm1, %v1050_v14  ;;  %995 = vmatmul.msk.bf16.vlgmr.msra.gmra.mxu1 %vm375_vm1, %v1050_v14 }
  0x20   : > { %597 = vperm.xlu2 %1089, %v523_v22  }
  0x26   : > { %602 = vperm.xlu0 %1087, %v524_v16   ;;  %587 = vperm.xlu1 %1088, %v521_v17  }
  0x28   : > { %592 = vperm.xlu2 %1089, %v522_v25  }
  0x2e   : > { %577 = vperm.xlu0 %1087, %v519_v19   ;;  %582 = vperm.xlu1 %1088, %v520_v20  }
  0x2f   : > { %992 = vmatmul.msk.bf16.gmra.mxu0 %vm375_vm1, %v1051_v21  ;;  %996 = vmatmul.msk.bf16.gmra.mxu1 %vm375_vm1, %v1051_v21 }
  0x30   : > { %567 = vperm.xlu2 %1089, %v517_v29  }
  0x36   : > { %572 = vperm.xlu0 %1087, %v518_v23   ;;  %557 = vperm.xlu1 %1088, %v515_v24  }
  0x38   : > { %562 = vperm.xlu2 %1089, %v516_v32  }
  0x3e   : > { %547 = vperm.xlu0 %1087, %v513_v26   ;;  %552 = vperm.xlu1 %1088, %v514_v27  }
  0x3f   : > { %993 = vmatmul.msk.bf16.gmra.mxu0 %vm375_vm1, %v1052_v28  ;;  %997 = vmatmul.msk.bf16.gmra.mxu1 %vm375_vm1, %v1052_v28 }
  0x40   : > { %537 = vperm.xlu2 %1089, %v511_v34  }
  0x46   : > { %542 = vperm.xlu0 %1087, %v512_v30   ;;  %527 = vperm.xlu1 %1088, %v509_v31  }
  0x48   : > { %532 = vperm.xlu2 %1089, %v510_v35  }
  0x4f   : > { %994 = vmatmul.msk.bf16.gmra.mxu0 %vm375_vm1, %v1053_v33  ;;  %998 = vmatmul.msk.bf16.gmra.mxu1 %vm375_vm1, %v1053_v33 }
  0x6a   : > { %v328_v50 = vpop.permute.xlu2 %327 }
  0x72   : > { %v333_v63 = vpop.permute.xlu2 %332 }
  0x80   : > { %v338_v46 = vpop.permute.xlu1 %337  ;;  %v348_v49 = vpop.permute.xlu0 %347 }
  0x88   : > { %v343_v53 = vpop.permute.xlu1 %342  ;;  %v353_v54 = vpop.permute.xlu0 %352 }
  0x90   : > { %v323_v7 = vpop.permute.xlu1 %322  ;;  %v318_v15 = vpop.permute.xlu0 %317 }
  0x9c   : > { %v404_v36 = vpop.f32.mrf.mxu0  ;;  %v433_v37 = vpop.f32.mrf.mxu1 }
  0x9d   : > { %v405_v28 = vadd.f32 %v404_v36, %v318_v15  ;;  %v434_v29 = vadd.f32 %v433_v37, %v318_v15 }
  0xa4   : > { %v406_v38 = vpop.f32.mrf.mxu0  ;;  %v435_v39 = vpop.f32.mrf.mxu1 }
  0xa5   : > { %v407_v20 = vadd.f32 %v406_v38, %v323_v7  ;;  %v436_v21 = vadd.f32 %v435_v39, %v323_v7 }
  0xa7   : > { %v455_v34 = vmul.f32 0.2, %v407_v20  ;;  %v456_v35 = vmul.f32 0.2, %v436_v21 }
  0xa9   : > { %v471_v36 = vmax.f32 %v407_v20, %v455_v34  ;;  %v472_v37 = vmax.f32 %v436_v21, %v456_v35 }
  0xac   : > { %v409_v40 = vpop.f32.mrf.mxu0  ;;  %v438_v41 = vpop.f32.mrf.mxu1 }
  0xad   : > { %v410_v11 = vadd.f32 %v409_v40, %v328_v50  ;;  %v439_v12 = vadd.f32 %v438_v41, %v328_v50 }
  0xaf   : > { %v457_v30 = vmul.f32 0.2, %v410_v11  ;;  %v458_v31 = vmul.f32 0.2, %v439_v12 }
  0xb4   : > { %v411_v42 = vpop.f32.mrf.mxu0  ;;  %v440_v43 = vpop.f32.mrf.mxu1 }
  0xb5   : > { %v412_v4 = vadd.f32 %v411_v42, %v333_v63  ;;  %v441_v5 = vadd.f32 %v440_v43, %v333_v63  ;;  %v453_v42 = vmul.f32 0.2, %v405_v28  ;;  %v454_v43 = vmul.f32 0.2, %v434_v29 }
  0xb7   : > { %v459_v22 = vmul.f32 0.2, %v412_v4  ;;  %v460_v23 = vmul.f32 0.2, %v441_v5 }
  0xb9   : > { %v475_v40 = vmax.f32 %v412_v4, %v459_v22  ;;  %v476_v41 = vmax.f32 %v441_v5, %v460_v23 }
  0xbc   : > { %v414_v44 = vpop.f32.mrf.mxu0  ;;  %v443_v45 = vpop.f32.mrf.mxu1 }
  0xbd   : > { %v415_v59 = vadd.f32 %v414_v44, %v338_v46  ;;  %v444_v60 = vadd.f32 %v443_v45, %v338_v46  ;;  %v473_v44 = vmax.f32 %v410_v11, %v457_v30  ;;  %v474_v45 = vmax.f32 %v439_v12, %v458_v31 }
  0xbf   : > { %v461_v13 = vmul.f32 0.2, %v415_v59  ;;  %v462_v14 = vmul.f32 0.2, %v444_v60  ;;  %v487_v46 = vpack.c.bf16 %v475_v40, %v473_v44 }
  0xc1   : > { %v477_v32 = vmax.f32 %v415_v59, %v461_v13  ;;  %v478_v33 = vmax.f32 %v444_v60, %v462_v14  ;;  %v1060_v59 = vld [vmem:[%s1389_s3 + $0x30] sm:$0xff]  ;;  %v1301_v60 = vpop.permute.xlu1 %587 }
  0xc4   : > { %v416_v47 = vpop.f32.mrf.mxu0  ;;  %v445_v48 = vpop.f32.mrf.mxu1 }
  0xc5   : > { %v417_v57 = vadd.f32 %v416_v47, %v343_v53  ;;  %v446_v58 = vadd.f32 %v445_v48, %v343_v53  ;;  %v488_v47 = vpack.c.bf16 %v476_v41, %v474_v45  ;;  %v469_v48 = vmax.f32 %v405_v28, %v453_v42  ;;  %v1055_v53 = vld [vmem:[%s1389_s3 + $0x8] sm:$0xff] }
  0xc7   : > { %v463_v6 = vmul.f32 0.2, %v417_v57  ;;  %v464_v8 = vmul.f32 0.2, %v446_v58  ;;  %v485_v50 = vpack.c.bf16 %v471_v36, %v469_v48 }
  0xc9   : > { %v479_v24 = vmax.f32 %v417_v57, %v463_v6  ;;  %v480_v25 = vmax.f32 %v446_v58, %v464_v8  ;;  %v1059_v57 = vld [vmem:[%s1389_s3 + $0x28] sm:$0xff]  ;;  %v1296_v58 = vpop.permute.xlu2 %597 }
  0xcb   : > { %v489_v38 = vpack.c.bf16 %v479_v24, %v477_v32  ;;  %v490_v39 = vpack.c.bf16 %v480_v25, %v478_v33 }
  0xcc   : > { %v419_v51 = vpop.f32.mrf.mxu0  ;;  %v448_v52 = vpop.f32.mrf.mxu1 }
  0xcd   : > { %v420_v55 = vadd.f32 %v419_v51, %v348_v49  ;;  %v449_v56 = vadd.f32 %v448_v52, %v348_v49  ;;  %v470_v49 = vmax.f32 %v434_v29, %v454_v43  ;;  %v1054_v52 = vld [vmem:[%s1389_s3] sm:$0xff] }
  0xcf   : > { %v465_v0 = vmul.f32 0.2, %v420_v55  ;;  %v466_v1 = vmul.f32 0.2, %v449_v56  ;;  %v486_v51 = vpack.c.bf16 %v472_v37, %v470_v49 }
  0xd1   : > { %v481_v16 = vmax.f32 %v420_v55, %v465_v0  ;;  %v482_v18 = vmax.f32 %v449_v56, %v466_v1  ;;  %v1057_v55 = vld [vmem:[%s1389_s3 + $0x18] sm:$0xff]  ;;  %v1058_v56 = vld [vmem:[%s1389_s3 + $0x20] sm:$0xff]  ;;  %v1316_v1 = vpop.permute.xlu0 %602 }
  0xd2   : > { %v1061_v0 = vld [vmem:[%s1389_s3 + $0x38] sm:$0xff] }
  0xd4   : > { %v421_v61 = vpop.f32.mrf.mxu0  ;;  %v450_v62 = vpop.f32.mrf.mxu1 }
  0xd5   : > { %v422_v2 = vadd.f32 %v421_v61, %v353_v54  ;;  %v451_v3 = vadd.f32 %v450_v62, %v353_v54  ;;  %v1056_v54 = vld [vmem:[%s1389_s3 + $0x10] sm:$0xff]  ;;  %v1305_v61 = vpop.permute.xlu2 %592  ;;  %v1307_v62 = vpop.permute.xlu1 %582 }
  0xd7   : > { %v467_v9 = vmul.f32 0.2, %v422_v2  ;;  %v468_v10 = vmul.f32 0.2, %v451_v3 }
  0xd9   : > { %v483_v17 = vmax.f32 %v422_v2, %v467_v9  ;;  %v484_v19 = vmax.f32 %v451_v3, %v468_v10  ;;  %v1322_v4 = vpop.permute.xlu0 %577 }
  0xdb   : > { %v491_v26 = vpack.c.bf16 %v483_v17, %v481_v16  ;;  %v492_v27 = vpack.c.bf16 %v484_v19, %v482_v18 }
  0xdd   : > { %674 = vmatpush.bf16.msra.mxu2 %v491_v26  ;;  %723 = vmatpush.bf16.msra.mxu3 %v492_v27  ;;  %v1309_v63 = vpop.permute.xlu2 %567  ;;  %v1318_v2 = vpop.permute.xlu1 %557 }
  0xe1   : > { %675 = vmatpush.bf16.msra.mxu2 %v489_v38  ;;  %724 = vmatpush.bf16.msra.mxu3 %v490_v39  ;;  %v1324_v9 = vpop.permute.xlu0 %572 }
  0xe5   : > { %676 = vmatpush.bf16.msra.mxu2 %v487_v46  ;;  %725 = vmatpush.bf16.msra.mxu3 %v488_v47  ;;  %v1320_v3 = vpop.permute.xlu2 %562  ;;  %v553_v5 = vpop.permute.xlu1 %552 }
  0xe9   : > { %677 = vmatpush.bf16.msra.mxu2 %v485_v50  ;;  %726 = vmatpush.bf16.msra.mxu3 %v486_v51  ;;  %v548_v22 = vpop.permute.xlu0 %547 }
  0xec   : > { %1031 = vmatmul.msk.bf16.vlgmr.msra.gmra.mxu2 %vm645_vm2, %v1054_v52  ;;  %1039 = vmatmul.msk.bf16.vlgmr.msra.gmra.mxu3 %vm645_vm2, %v1054_v52 }
  0xed   : > { %v538_v6 = vpop.permute.xlu2 %537  ;;  %v528_v10 = vpop.permute.xlu1 %527 }
  0xf1   : > { %v543_v33 = vpop.permute.xlu0 %542 }
  0xf5   : > { %v533_v13 = vpop.permute.xlu2 %532 }
  0xfc   : > { %1032 = vmatmul.msk.bf16.gmra.mxu2 %vm645_vm2, %v1055_v53  ;;  %1040 = vmatmul.msk.bf16.gmra.mxu3 %vm645_vm2, %v1055_v53 }
 0x10c   : > { %1033 = vmatmul.msk.bf16.gmra.mxu2 %vm645_vm2, %v1056_v54  ;;  %1041 = vmatmul.msk.bf16.gmra.mxu3 %vm645_vm2, %v1056_v54 }
 0x11c   : > { %1034 = vmatmul.msk.bf16.gmra.mxu2 %vm645_vm2, %v1057_v55  ;;  %1042 = vmatmul.msk.bf16.gmra.mxu3 %vm645_vm2, %v1057_v55 }
 0x12c   : > { %1035 = vmatmul.msk.bf16.gmra.mxu2 %vm645_vm2, %v1058_v56  ;;  %1043 = vmatmul.msk.bf16.gmra.mxu3 %vm645_vm2, %v1058_v56 }
 0x13c   : > { %1036 = vmatmul.msk.bf16.gmra.mxu2 %vm645_vm2, %v1059_v57  ;;  %1044 = vmatmul.msk.bf16.gmra.mxu3 %vm645_vm2, %v1059_v57 }
 0x14c   : > { %1037 = vmatmul.msk.bf16.gmra.mxu2 %vm645_vm2, %v1060_v59  ;;  %1045 = vmatmul.msk.bf16.gmra.mxu3 %vm645_vm2, %v1060_v59 }
 0x15c   : > { %1038 = vmatmul.msk.bf16.gmra.mxu2 %vm645_vm2, %v1061_v0  ;;  %1046 = vmatmul.msk.bf16.gmra.mxu3 %vm645_vm2, %v1061_v0 }
 0x16f   : > { %v679_v7 = vpop.f32.mrf.mxu2  ;;  %v728_v8 = vpop.f32.mrf.mxu3 }
 0x170   : > { %v680_v11 = vadd.f32 %v679_v7, %v528_v10  ;;  %v729_v12 = vadd.f32 %v728_v8, %v528_v10 }
 0x172   : > { %v768_v16 = vmul.f32 0.2, %v680_v11  ;;  %v769_v17 = vmul.f32 0.2, %v729_v12 }
 0x174   : > { %v800_v23 = vmax.f32 %v680_v11, %v768_v16  ;;  %v801_v24 = vmax.f32 %v729_v12, %v769_v17 }
 0x177   : > { %v681_v14 = vpop.f32.mrf.mxu2  ;;  %v730_v15 = vpop.f32.mrf.mxu3 }
 0x178   : > { %v682_v18 = vadd.f32 %v681_v14, %v533_v13  ;;  %v731_v19 = vadd.f32 %v730_v15, %v533_v13 }
 0x17a   : > { %v770_v20 = vmul.f32 0.2, %v682_v18  ;;  %v771_v21 = vmul.f32 0.2, %v731_v19 }
 0x17c   : > { %v802_v25 = vmax.f32 %v682_v18, %v770_v20  ;;  %v803_v26 = vmax.f32 %v731_v19, %v771_v21 }
 0x17e   : > { %v1326_v27 = vpack.c.bf16 %v802_v25, %v800_v23  ;;  %v1328_v28 = vpack.c.bf16 %v803_v26, %v801_v24 }
 0x17f   : > { %v684_v29 = vpop.f32.mrf.mxu2  ;;  %v733_v30 = vpop.f32.mrf.mxu3 }
 0x180   : > { %v685_v31 = vadd.f32 %v684_v29, %v538_v6  ;;  %v734_v32 = vadd.f32 %v733_v30, %v538_v6 }
 0x182   : > { %v772_v40 = vmul.f32 0.2, %v685_v31  ;;  %v773_v41 = vmul.f32 0.2, %v734_v32 }
 0x184   : > { %v804_v44 = vmax.f32 %v685_v31, %v772_v40  ;;  %v805_v45 = vmax.f32 %v734_v32, %v773_v41 }
 0x187   : > { %v686_v34 = vpop.f32.mrf.mxu2  ;;  %v735_v35 = vpop.f32.mrf.mxu3 }
 0x188   : > { %v687_v38 = vadd.f32 %v686_v34, %v543_v33  ;;  %v736_v39 = vadd.f32 %v735_v35, %v543_v33 }
 0x18a   : > { %v774_v42 = vmul.f32 0.2, %v687_v38  ;;  %v775_v43 = vmul.f32 0.2, %v736_v39 }
 0x18c   : > { %v806_v36 = vmax.f32 %v687_v38, %v774_v42  ;;  %v807_v37 = vmax.f32 %v736_v39, %v775_v43 }
 0x18e   : > { %v1330_v46 = vpack.c.bf16 %v806_v36, %v804_v44  ;;  %v1332_v47 = vpack.c.bf16 %v807_v37, %v805_v45 }
 0x18f   : > { %v689_v48 = vpop.f32.mrf.mxu2  ;;  %v738_v49 = vpop.f32.mrf.mxu3 }
 0x190   : > { %v690_v50 = vadd.f32 %v689_v48, %v548_v22  ;;  %v739_v51 = vadd.f32 %v738_v49, %v548_v22 }
 0x192   : > { %v776_v54 = vmul.f32 0.2, %v690_v50  ;;  %v777_v55 = vmul.f32 0.2, %v739_v51 }
 0x194   : > { %v808_v6 = vmax.f32 %v690_v50, %v776_v54  ;;  %v809_v7 = vmax.f32 %v739_v51, %v777_v55 }
 0x197   : > { %v691_v52 = vpop.f32.mrf.mxu2  ;;  %v740_v53 = vpop.f32.mrf.mxu3 }
 0x198   : > { %v692_v56 = vadd.f32 %v691_v52, %v553_v5  ;;  %v741_v57 = vadd.f32 %v740_v53, %v553_v5 }
 0x19a   : > { %v778_v59 = vmul.f32 0.2, %v692_v56  ;;  %v779_v0 = vmul.f32 0.2, %v741_v57 }
 0x19c   : > { %v810_v8 = vmax.f32 %v692_v56, %v778_v59  ;;  %v811_v10 = vmax.f32 %v741_v57, %v779_v0 }
 0x19e   : > { %v1334_v11 = vpack.c.bf16 %v810_v8, %v808_v6  ;;  %v1336_v12 = vpack.c.bf16 %v811_v10, %v809_v7 }
 0x19f   : > { %v694_v13 = vpop.f32.mrf.mxu2  ;;  %v743_v14 = vpop.f32.mrf.mxu3 }
 0x1a0   : > { %v695_v15 = vadd.f32 %v694_v13, %v1318_v2  ;;  %v744_v16 = vadd.f32 %v743_v14, %v1318_v2 }
 0x1a2   : > { %v780_v19 = vmul.f32 0.2, %v695_v15  ;;  %v781_v5 = vmul.f32 0.2, %v744_v16 }
 0x1a4   : > { %v812_v24 = vmax.f32 %v695_v15, %v780_v19  ;;  %v813_v25 = vmax.f32 %v744_v16, %v781_v5 }
 0x1a7   : > { %v696_v17 = vpop.f32.mrf.mxu2  ;;  %v745_v18 = vpop.f32.mrf.mxu3 }
 0x1a8   : > { %v697_v20 = vadd.f32 %v696_v17, %v1320_v3  ;;  %v746_v21 = vadd.f32 %v745_v18, %v1320_v3 }
 0x1aa   : > { %v782_v22 = vmul.f32 0.2, %v697_v20  ;;  %v783_v23 = vmul.f32 0.2, %v746_v21 }
 0x1ac   : > { %v814_v26 = vmax.f32 %v697_v20, %v782_v22  ;;  %v815_v29 = vmax.f32 %v746_v21, %v783_v23 }
 0x1ae   : > { %v1342_v30 = vpack.c.bf16 %v814_v26, %v812_v24  ;;  %v1344_v31 = vpack.c.bf16 %v815_v29, %v813_v25 }
 0x1af   : > { %v699_v32 = vpop.f32.mrf.mxu2  ;;  %v748_v2 = vpop.f32.mrf.mxu3 }
 0x1b0   : > { %v700_v23 = vadd.f32 %v699_v32, %v1309_v63 }
 0x1b7   : > { %v701_v33 = vpop.f32.mrf.mxu2  ;;  %v750_v34 = vpop.f32.mrf.mxu3 }
 0x1b8   : > { %v751_v18 = vadd.f32 %v750_v34, %v1324_v9 }
 0x1bf   : > { %v704_v35 = vpop.f32.mrf.mxu2  ;;  %v753_v40 = vpop.f32.mrf.mxu3 }
 0x1c0   : > { %v705_v8 = vadd.f32 %v704_v35, %v1322_v4 }
 0x1c2   : > { %v788_v24 = vmul.f32 0.2, %v705_v8 }
 0x1c7   : > { %v706_v41 = vpop.f32.mrf.mxu2  ;;  %v755_v38 = vpop.f32.mrf.mxu3 }
 0x1c8   : > { %v707_v59 = vadd.f32 %v706_v41, %v1307_v62 }
 0x1ca   : > { %v790_v19 = vmul.f32 0.2, %v707_v59 }
 0x1cf   : > { %v709_v39 = vpop.f32.mrf.mxu2  ;;  %v758_v3 = vpop.f32.mrf.mxu3 }
 0x1d0   : > { %v710_v50 = vadd.f32 %v709_v39, %v1301_v60  ;;  %v759_v51 = vadd.f32 %v758_v3, %v1301_v60  ;;  %v754_v60 = vadd.f32 %v753_v40, %v1322_v4  ;;  %v749_v4 = vadd.f32 %v748_v2, %v1309_v63 }
 0x1d1   : > { %v822_v40 = vmax.f32 %v707_v59, %v790_v19  ;;  %v820_v3 = vmax.f32 %v705_v8, %v788_v24 }
 0x1d2   : > { %v792_v10 = vmul.f32 0.2, %v710_v50  ;;  %v793_v13 = vmul.f32 0.2, %v759_v51  ;;  %v789_v25 = vmul.f32 0.2, %v754_v60 }
 0x1d3   : > { %v785_v39 = vmul.f32 0.2, %v749_v4  ;;  %v842_v2 = vpack.c.bf16 %v822_v40, %v820_v3 }
 0x1d4   : > { %v824_v26 = vmax.f32 %v710_v50, %v792_v10  ;;  %v825_v29 = vmax.f32 %v759_v51, %v793_v13 }
 0x1d7   : > { %v711_v42 = vpop.f32.mrf.mxu2  ;;  %v760_v43 = vpop.f32.mrf.mxu3 }
 0x1d8   : > { %v712_v48 = vadd.f32 %v711_v42, %v1305_v61  ;;  %v761_v49 = vadd.f32 %v760_v43, %v1305_v61  ;;  %v821_v42 = vmax.f32 %v754_v60, %v789_v25 }
 0x1da   : > { %v794_v0 = vmul.f32 0.2, %v712_v48  ;;  %v795_v6 = vmul.f32 0.2, %v761_v49 }
 0x1dc   : > { %v826_v5 = vmax.f32 %v712_v48, %v794_v0  ;;  %v827_v20 = vmax.f32 %v761_v49, %v795_v6  ;;  %v848_v48 = vld [vmem:[%s1391_s5] sm:$0x1] }
 0x1de   : > { %v844_v34 = vpack.c.bf16 %v826_v5, %v824_v26  ;;  %v845_v41 = vpack.c.bf16 %v827_v20, %v825_v29 }
 0x1df   : > { %v714_v44 = vpop.f32.mrf.mxu2  ;;  %v763_v45 = vpop.f32.mrf.mxu3 }
 0x1e0   : > { %v715_v36 = vadd.f32 %v714_v44, %v1296_v58  ;;  %v764_v37 = vadd.f32 %v763_v45, %v1296_v58  ;;  %v756_v58 = vadd.f32 %v755_v38, %v1307_v62  ;;  %v784_v38 = vmul.f32 0.2, %v700_v23 }
 0x1e1   : > { %v817_v45 = vmax.f32 %v749_v4, %v785_v39 }
 0x1e2   : > { %v796_v54 = vmul.f32 0.2, %v715_v36  ;;  %v797_v55 = vmul.f32 0.2, %v764_v37  ;;  %v791_v62 = vmul.f32 0.2, %v756_v58  ;;  %v816_v44 = vmax.f32 %v700_v23, %v784_v38 }
 0x1e4   : > { %v828_v14 = vmax.f32 %v715_v36, %v796_v54  ;;  %v829_v15 = vmax.f32 %v764_v37, %v797_v55 }
 0x1e7   : > { %v716_v52 = vpop.f32.mrf.mxu2  ;;  %v765_v53 = vpop.f32.mrf.mxu3 }
 0x1e8   : > { %v717_v56 = vadd.f32 %v716_v52, %v1316_v1  ;;  %v766_v57 = vadd.f32 %v765_v53, %v1316_v1  ;;  %v702_v1 = vadd.f32 %v701_v33, %v1324_v9  ;;  %v787_v33 = vmul.f32 0.2, %v751_v18 }
 0x1e9   : > { %v823_v9 = vmax.f32 %v756_v58, %v791_v62 }
 0x1ea   : > { %v798_v7 = vmul.f32 0.2, %v717_v56  ;;  %v799_v61 = vmul.f32 0.2, %v766_v57  ;;  %v786_v35 = vmul.f32 0.2, %v702_v1  ;;  %v819_v63 = vmax.f32 %v751_v18, %v787_v33 }
 0x1eb   : > { %v843_v43 = vpack.c.bf16 %v823_v9, %v821_v42 }
 0x1ec   : > { %v830_v16 = vmax.f32 %v717_v56, %v798_v7  ;;  %v831_v17 = vmax.f32 %v766_v57, %v799_v61  ;;  %v818_v32 = vmax.f32 %v702_v1, %v786_v35  ;;  %v841_v37 = vpack.c.bf16 %v819_v63, %v817_v45 }
 0x1ee   : > { %v846_v21 = vpack.c.bf16 %v830_v16, %v828_v14  ;;  %v847_v22 = vpack.c.bf16 %v831_v17, %v829_v15  ;;  %v840_v36 = vpack.c.bf16 %v818_v32, %v816_v44 }
 0x1f0   : > { %849 = vmatpush.bf16.msrb.mxu0 %v846_v21  ;;  %862 = vmatpush.bf16.msrb.mxu1 %v847_v22 }
 0x1f4   : > { %850 = vmatpush.bf16.msrb.mxu0 %v844_v34  ;;  %863 = vmatpush.bf16.msrb.mxu1 %v845_v41 }
 0x1f8   : > { %851 = vmatpush.bf16.msrb.mxu0 %v842_v2  ;;  %864 = vmatpush.bf16.msrb.mxu1 %v843_v43 }
 0x1fc   : > { %852 = vmatpush.bf16.msrb.mxu0 %v840_v36  ;;  %865 = vmatpush.bf16.msrb.mxu1 %v841_v37 }
 0x200   : > { %853 = vmatpush.bf16.msrb.mxu0 %v1342_v30  ;;  %866 = vmatpush.bf16.msrb.mxu1 %v1344_v31  ;;  %v881_v30 = vlaneseq }
 0x202   : > { %vm883_vm4 = vcmp.lt.s32.totalorder %v881_v30, 256 }
 0x204   : > { %854 = vmatpush.bf16.msrb.mxu0 %v1334_v11  ;;  %867 = vmatpush.bf16.msrb.mxu1 %v1336_v12 }
 0x208   : > { %855 = vmatpush.bf16.msrb.mxu0 %v1330_v46  ;;  %868 = vmatpush.bf16.msrb.mxu1 %v1332_v47 }
 0x20c   : > { %856 = vmatpush.bf16.msrb.mxu0 %v1326_v27  ;;  %869 = vmatpush.bf16.msrb.mxu1 %v1328_v28 }
 0x20f   : > { %857 = vmatmul.bf16.vlgmr.msrb.gmra.mxu0 %v848_v48  ;;  %870 = vmatmul.bf16.vlgmr.msrb.gmra.mxu1 %v848_v48 }
 0x28c   : > { %v858_v31 = vpop.f32.mrf.mxu0  ;;  %v871_v11 = vpop.f32.mrf.mxu1 }
 0x28d   : > { %v877_v46 = vrot.slane %v871_v11, 7 }
 0x28f   : > { %v879_v27 = vsel %vm878_vm3, %v858_v31, %v877_v46 }
 0x290   : > { %885 = vst.msk [vmem:[%s287_s26] sm:$0x3] %vm883_vm4, %v879_v27 }
 0x294   : > { %v860_v28 = vpop.f32.mrf.mxu0  ;;  %v873_v47 = vpop.f32.mrf.mxu1 }
 0x295 PF: > { %s16_s23 = sadd.s32 1, %s1112_s23   ;;  %s1393_s21 = smov %s1108_s22 }
 0x296   : > { %p13_p5 = scmp.ge.s32.totalorder %s16_s23, 4   ;;  %s1394_s22 = smov %s1396_s24 }
 0x298   :  { %15 = sbr.rel (!%p13_p5) target bundleno = 2 (0x2), region = 74 }

</bundles_post_ra>
